<compile_context>
chip_gen: v7x
topology: tpu7x:2x2x1
jax: 0.10.0
libtpu: 0.0.40
codegen_flags: <defaults>
</compile_context>

<pallas_src>
import functools

import jax
import jax.numpy as jnp
from jax.experimental import pallas as pl
from jax.experimental.pallas import tpu as pltpu

EPS = 1e-5
MXU_DTYPE = jnp.bfloat16      # MXU operand dtype; accumulation is f32
ACT_DTYPE = jnp.bfloat16      # inter-kernel activation storage dtype (HBM)
TARGET_ROWS = 2048            # target flattened rows per grid step
IM2COL_FULL_CIN_MAX = 64      # full K=9*Cin im2col below this channel count


def _default_vmem_limit():
    """Generation-aware scoped-VMEM budget with headroom."""
    cap = None
    try:
        cap = int(getattr(pltpu.get_tpu_info(), "vmem_capacity_bytes", 0)) or None
    except Exception:
        cap = None
    if cap is None:
        return 48 * 1024 * 1024          # safe on v5e/v6e/v7x
    return (cap // 4) * 3                # 96 MiB on 128-MiB chips, 48 MiB on v7x


VMEM_LIMIT_BYTES = _default_vmem_limit()


# ------------------------------ Pallas kernels -------------------------------

def _bn_stats_epilogue(vals, m_total, gamma_ref, beta_ref, scale_ref, bias_ref,
                       stat_ref):
    """Accumulate per-channel sum / sum-of-squares of f32 `vals` (M, C) into a
    VMEM scratch across the grid; finalize BN scale/bias on the last step.

    Training-mode BN, biased variance, var = E[x^2] - mean^2 in f32.
    """
    i = pl.program_id(0)

    @pl.when(i == 0)
    def _():
        stat_ref[...] = jnp.zeros_like(stat_ref)

    stat_ref[0:1, :] += jnp.sum(vals, axis=0, keepdims=True)
    stat_ref[1:2, :] += jnp.sum(vals * vals, axis=0, keepdims=True)

    @pl.when(i == pl.num_programs(0) - 1)
    def _():
        mean = stat_ref[0:1, :] / m_total
        var = stat_ref[1:2, :] / m_total - mean * mean        # biased variance
        inv = jax.lax.rsqrt(var + EPS)
        scale = gamma_ref[...] * inv
        scale_ref[...] = scale
        bias_ref[...] = beta_ref[...] - mean * scale


def _bn_stats_kernel(m_total, x_ref, gamma_ref, beta_ref,
                     scale_ref, bias_ref, stat_ref):
    """Standalone BN statistics (only needed for the very first block's BN1)."""
    c = x_ref.shape[-1]
    x = x_ref[...].astype(jnp.float32).reshape(-1, c)
    _bn_stats_epilogue(x, m_total, gamma_ref, beta_ref, scale_ref, bias_ref,
                       stat_ref)


def _bn_relu_prologue(x_ref, scale_ref, bias_ref):
    """relu(x*scale + bias) on the flattened tile, f32 (== relu(BN(x)))."""
    c = x_ref.shape[-1]
    x = x_ref[...].astype(jnp.float32).reshape(-1, c)
    return jnp.maximum(x * scale_ref[...] + bias_ref[...], 0.0)


def _conv3x3(a, w_ref, h, w, mode):
    """SAME 3x3 conv (stride 1) of flattened activation a: (M, Cin) f32.

    Each tap = pltpu.roll of the flattened tile (XLU) + iota mask zeroing
    out-of-image rows.  `mode` selects the MXU strategy:
      "im2col9": one K=9*Cin matmul (weight ref (9*Cin, Cout))
      "dy3"    : three K=3*Cin matmuls grouped by dy (weight ref (3, 3*Cin, Cout))
      "per_tap": nine K=Cin matmuls (weight ref (3, 3, Cin, Cout)) - fallback.
    Returns the f32 (M, Cout) conv result (value accumulation; no scratch RMW).
    """
    m, _ = a.shape
    row = jax.lax.broadcasted_iota(jnp.int32, (m, 1), 0)
    yy = (row // w) % h
    xx = row % w

    def tap(dy, dx):
        if dy == 0 and dx == 0:
            return a
        s = dy * w + dx                                   # flattened row shift
        shifted = pltpu.roll(a, (-s) % m, axis=0)
        valid = ((yy + dy >= 0) & (yy + dy < h) &
                 (xx + dx >= 0) & (xx + dx < w))
        return jnp.where(valid, shifted, 0.0)

    offs = [(dy, dx) for dy in (-1, 0, 1) for dx in (-1, 0, 1)]

    if mode == "im2col9":
        patch = jnp.concatenate([tap(dy, dx) for dy, dx in offs], axis=-1)
        return jnp.dot(patch.astype(MXU_DTYPE), w_ref[...],
                       preferred_element_type=jnp.float32)

    if mode == "dy3":
        acc = None
        for g, dy in enumerate((-1, 0, 1)):
            patch = jnp.concatenate([tap(dy, dx) for dx in (-1, 0, 1)], axis=-1)
            part = jnp.dot(patch.astype(MXU_DTYPE), w_ref[g],
                           preferred_element_type=jnp.float32)
            acc = part if acc is None else acc + part
        return acc

    # "per_tap" fallback (no lane-dim concatenation; known-safe lowering).
    acc = None
    for dy, dx in offs:
        part = jnp.dot(tap(dy, dx).astype(MXU_DTYPE), w_ref[dy + 1, dx + 1],
                       preferred_element_type=jnp.float32)
        acc = part if acc is None else acc + part
    return acc


def _conv1_kernel(h, w, mode, m_total,
                  x_ref, scale1_ref, bias1_ref, w3_ref, g2_ref, b2_ref,
                  h1_ref, scale2_ref, bias2_ref, stat_ref):
    """h1 = conv3x3(relu(bn1(x))); BN2 statistics fused into the epilogue."""
    a = _bn_relu_prologue(x_ref, scale1_ref, bias1_ref)
    conv = _conv3x3(a, w3_ref, h, w, mode)
    h1_ref[...] = conv.reshape(h1_ref.shape).astype(h1_ref.dtype)
    _bn_stats_epilogue(conv, m_total, g2_ref, b2_ref,
                       scale2_ref, bias2_ref, stat_ref)


def _conv1_shortcut_kernel(h, w, mode, m_total,
                           x_ref, scale1_ref, bias1_ref, w3_ref, ws_ref,
                           g2_ref, b2_ref,
                           h1_ref, sc_ref, scale2_ref, bias2_ref, stat_ref):
    """_conv1_kernel + fused 1x1 DecConv2d shortcut on relu(bn1(x))."""
    a = _bn_relu_prologue(x_ref, scale1_ref, bias1_ref)
    conv = _conv3x3(a, w3_ref, h, w, mode)
    h1_ref[...] = conv.reshape(h1_ref.shape).astype(h1_ref.dtype)
    sc = jnp.dot(a.astype(MXU_DTYPE), ws_ref[...],
                 preferred_element_type=jnp.float32)
    sc_ref[...] = sc.reshape(sc_ref.shape).astype(sc_ref.dtype)
    _bn_stats_epilogue(conv, m_total, g2_ref, b2_ref,
                       scale2_ref, bias2_ref, stat_ref)


def _conv2_add_kernel(h, w, mode, m_total,
                      h1_ref, scale2_ref, bias2_ref, w3_ref, res_ref,
                      g1n_ref, b1n_ref,
                      out_ref, scale1n_ref, bias1n_ref, stat_ref):
    """out = conv3x3(relu(bn2(h1))) + residual; next block's BN1 stats fused."""
    a = _bn_relu_prologue(h1_ref, scale2_ref, bias2_ref)
    conv = _conv3x3(a, w3_ref, h, w, mode)
    cout = out_ref.shape[-1]
    res = res_ref[...].astype(jnp.float32).reshape(-1, cout)
    out = conv + res
    out_ref[...] = out.reshape(out_ref.shape).astype(out_ref.dtype)
    _bn_stats_epilogue(out, m_total, g1n_ref, b1n_ref,
                       scale1n_ref, bias1n_ref, stat_ref)


# ------------------------------- JAX wrappers ---------------------------------

def _resident(shape):
    """BlockSpec for an array that stays fully VMEM-resident (constant index)."""
    nd = len(shape)
    return pl.BlockSpec(shape, lambda i, _nd=nd: (0,) * _nd)


def _prep_conv3x3_weight(w_hwio, conv_mode):
    """Cast the HWIO weight to bf16 once and reshape for the chosen MXU mode."""
    cin, cout = int(w_hwio.shape[2]), int(w_hwio.shape[3])
    w = w_hwio.astype(MXU_DTYPE)
    if conv_mode == "per_tap":
        return "per_tap", w                                  # (3,3,Cin,Cout)
    if cin <= IM2COL_FULL_CIN_MAX:
        return "im2col9", w.reshape(9 * cin, cout)           # (9*Cin,Cout)
    return "dy3", w.reshape(3, 3 * cin, cout)                # (3,3*Cin,Cout)


def _pick_tile_n(n, hw, max_c):
    """Images per grid step: target ~TARGET_ROWS flattened rows within VMEM."""
    patch_cols = 9 * max_c if max_c <= IM2COL_FULL_CIN_MAX else 3 * max_c
    per_image = hw * (
        max_c * (2 * 4          # double-buffered input tile (f32 worst case)
                 + 2 * 2 * 2    # double-buffered output + residual (bf16)
                 + 4            # f32 conv result
                 + 4)           # BN/ReLU prologue activation (f32)
        + patch_cols * 6)       # im2col patch (f32 taps + bf16 copy)
    budget = VMEM_LIMIT_BYTES // 2       # headroom for weights / compiler temps
    tile_n = min(n, max(1, TARGET_ROWS // hw), max(1, budget // per_image))
    while n % tile_n:
        tile_n -= 1    # TODO(synk): odd/prime batch sizes degrade toward tile_n=1
    return tile_n


def bn_scale_bias(x, gamma, beta, tile_n):
    """Training-mode BN over (N, H*W, C) -> (scale, bias), each (1, C) f32."""
    n, hw, c = x.shape
    vec = _resident((1, c))
    scale, bias = pl.pallas_call(
        functools.partial(_bn_stats_kernel, float(n * hw)),
        grid_spec=pltpu.PrefetchScalarGridSpec(
            num_scalar_prefetch=0,
            grid=(n // tile_n,),
            in_specs=[pl.BlockSpec((tile_n, hw, c), lambda i: (i, 0, 0)),
                      vec, vec],
            out_specs=[_resident((1, c)), _resident((1, c))],
            scratch_shapes=[pltpu.VMEM((2, c), jnp.float32)],
        ),
        out_shape=[jax.ShapeDtypeStruct((1, c), jnp.float32)] * 2,
        compiler_params=pltpu.CompilerParams(
            dimension_semantics=("arbitrary",),   # output-resident accumulator
            vmem_limit_bytes=VMEM_LIMIT_BYTES),
    )(x, gamma.reshape(1, c), beta.reshape(1, c))
    return scale, bias


def conv1_bn_relu(x, scale1, bias1, w3, mode, g2, b2, h, w, tile_n, out_dtype):
    n, hw, cin = x.shape
    cout = w3.shape[-1]
    vec_in, vec_out = _resident((1, cin)), _resident((1, cout))
    h1, scale2, bias2 = pl.pallas_call(
        functools.partial(_conv1_kernel, h, w, mode, float(n * hw)),
        grid_spec=pltpu.PrefetchScalarGridSpec(
            num_scalar_prefetch=0,
            grid=(n // tile_n,),
            in_specs=[pl.BlockSpec((tile_n, hw, cin), lambda i: (i, 0, 0)),
                      vec_in, vec_in, _resident(w3.shape), vec_out, vec_out],
            out_specs=[pl.BlockSpec((tile_n, hw, cout), lambda i: (i, 0, 0)),
                       _resident((1, cout)), _resident((1, cout))],
            scratch_shapes=[pltpu.VMEM((2, cout), jnp.float32)],
        ),
        out_shape=[jax.ShapeDtypeStruct((n, hw, cout), out_dtype),
                   jax.ShapeDtypeStruct((1, cout), jnp.float32),
                   jax.ShapeDtypeStruct((1, cout), jnp.float32)],
        compiler_params=pltpu.CompilerParams(
            dimension_semantics=("arbitrary",),   # fused stats across the grid
            vmem_limit_bytes=VMEM_LIMIT_BYTES),
    )(x, scale1, bias1, w3, g2.reshape(1, cout), b2.reshape(1, cout))
    return h1, scale2, bias2


def conv1_bn_relu_shortcut(x, scale1, bias1, w3, ws, mode, g2, b2, h, w,
                           tile_n, out_dtype):
    n, hw, cin = x.shape
    cout = w3.shape[-1]
    vec_in, vec_out = _resident((1, cin)), _resident((1, cout))
    h1, sc, scale2, bias2 = pl.pallas_call(
        functools.partial(_conv1_shortcut_kernel, h, w, mode, float(n * hw)),
        grid_spec=pltpu.PrefetchScalarGridSpec(
            num_scalar_prefetch=0,
            grid=(n // tile_n,),
            in_specs=[pl.BlockSpec((tile_n, hw, cin), lambda i: (i, 0, 0)),
                      vec_in, vec_in, _resident(w3.shape),
                      _resident((cin, cout)), vec_out, vec_out],
            out_specs=[pl.BlockSpec((tile_n, hw, cout), lambda i: (i, 0, 0)),
                       pl.BlockSpec((tile_n, hw, cout), lambda i: (i, 0, 0)),
                       _resident((1, cout)), _resident((1, cout))],
            scratch_shapes=[pltpu.VMEM((2, cout), jnp.float32)],
        ),
        out_shape=[jax.ShapeDtypeStruct((n, hw, cout), out_dtype),
                   jax.ShapeDtypeStruct((n, hw, cout), out_dtype),
                   jax.ShapeDtypeStruct((1, cout), jnp.float32),
                   jax.ShapeDtypeStruct((1, cout), jnp.float32)],
        compiler_params=pltpu.CompilerParams(
            dimension_semantics=("arbitrary",),
            vmem_limit_bytes=VMEM_LIMIT_BYTES),
    )(x, scale1, bias1, w3, ws, g2.reshape(1, cout), b2.reshape(1, cout))
    return h1, sc, scale2, bias2


def conv2_bn_relu_add(h1, scale2, bias2, w3, mode, res, g1n, b1n, h, w,
                      tile_n, out_dtype):
    n, hw, cin = h1.shape
    cout = w3.shape[-1]
    vec_in, vec_out = _resident((1, cin)), _resident((1, cout))
    out, scale1n, bias1n = pl.pallas_call(
        functools.partial(_conv2_add_kernel, h, w, mode, float(n * hw)),
        grid_spec=pltpu.PrefetchScalarGridSpec(
            num_scalar_prefetch=0,
            grid=(n // tile_n,),
            in_specs=[pl.BlockSpec((tile_n, hw, cin), lambda i: (i, 0, 0)),
                      vec_in, vec_in, _resident(w3.shape),
                      pl.BlockSpec((tile_n, hw, cout), lambda i: (i, 0, 0)),
                      vec_out, vec_out],
            out_specs=[pl.BlockSpec((tile_n, hw, cout), lambda i: (i, 0, 0)),
                       _resident((1, cout)), _resident((1, cout))],
            scratch_shapes=[pltpu.VMEM((2, cout), jnp.float32)],
        ),
        out_shape=[jax.ShapeDtypeStruct((n, hw, cout), out_dtype),
                   jax.ShapeDtypeStruct((1, cout), jnp.float32),
                   jax.ShapeDtypeStruct((1, cout), jnp.float32)],
        compiler_params=pltpu.CompilerParams(
            dimension_semantics=("arbitrary",),
            vmem_limit_bytes=VMEM_LIMIT_BYTES),
    )(h1, scale2, bias2, w3, res, g1n.reshape(1, cout), b1n.reshape(1, cout))
    return out, scale1n, bias1n


def dec_basic_block_nhwc(x, h, w, p, next_p, scale1, bias1, tile_n, conv_mode,
                         out_dtype):
    """One Dec-WideResNet BasicBlock on channels-last (N, H*W, Cin) input.

    Returns (out, scale1_next, bias1_next) where the latter two are the fused
    BN1 scale/bias of the NEXT block (computed in conv2's epilogue).
    """
    n, hw, cin = x.shape
    cout = int(p["conv2_sigma"].shape[-1])
    equal_inout = (cin == cout)

    # DecConv2d effective weight = sigma_weight + phi_weight; bf16 once here.
    mode1, w1 = _prep_conv3x3_weight(p["conv1_sigma"] + p["conv1_phi"], conv_mode)
    mode2, w2 = _prep_conv3x3_weight(p["conv2_sigma"] + p["conv2_phi"], conv_mode)

    g2, b2 = p["bn2_gamma"], p["bn2_beta"]
    if equal_inout:
        h1, scale2, bias2 = conv1_bn_relu(
            x, scale1, bias1, w1, mode1, g2, b2, h, w, tile_n, ACT_DTYPE)
        res = x                                   # identity shortcut: original x
    else:
        ws = (p["short_sigma"] + p["short_phi"]).reshape(cin, cout).astype(MXU_DTYPE)
        h1, res, scale2, bias2 = conv1_bn_relu_shortcut(
            x, scale1, bias1, w1, ws, mode1, g2, b2, h, w, tile_n, ACT_DTYPE)

    if next_p is not None:
        g1n, b1n = next_p["bn1_gamma"], next_p["bn1_beta"]
    else:                                         # last block: stats discarded
        g1n = jnp.ones((cout,), jnp.float32)
        b1n = jnp.zeros((cout,), jnp.float32)

    # TODO(synk): F.dropout with drop_rate > 0 not implemented (identity at 0.0).
    return conv2_bn_relu_add(h1, scale2, bias2, w2, mode2, res, g1n, b1n,
                             h, w, tile_n, out_dtype)


def network_block_forward(x_nchw, blocks, conv_mode="grouped"):
    """NetworkBlock.forward: sequentially apply the BasicBlocks (stride=1)."""
    n, cin, h, w = x_nchw.shape
    hw = h * w
    max_c = max([cin] + [int(p["conv2_sigma"].shape[-1]) for p in blocks])
    tile_n = _pick_tile_n(n, hw, max_c)

    # Single NCHW->NHWC conversion; intermediates stay channels-last (bf16).
    x = jnp.transpose(x_nchw, (0, 2, 3, 1)).reshape(n, hw, cin).astype(jnp.float32)

    # BN1 stats of the first block (later blocks get them from conv2's epilogue).
    scale1, bias1 = bn_scale_bias(x, blocks[0]["bn1_gamma"],
                                  blocks[0]["bn1_beta"], tile_n)
    for idx, p in enumerate(blocks):
        next_p = blocks[idx + 1] if idx + 1 < len(blocks) else None
        out_dtype = ACT_DTYPE if next_p is not None else jnp.float32
        x, scale1, bias1 = dec_basic_block_nhwc(
            x, h, w, p, next_p, scale1, bias1, tile_n, conv_mode, out_dtype)

    cout = x.shape[-1]
    return jnp.transpose(x.reshape(n, h, w, cout), (0, 3, 1, 2)).astype(jnp.float32)


# ---------------------------- pure-JAX reference ------------------------------

def ref_network_block(x_nchw, blocks):
    """Faithful model of the Pallas pipeline: bf16 MXU operands + f32 acc,
    BN statistics from the f32 pre-store activations, activations rounded to
    ACT_DTYPE between kernels / blocks (final block output kept f32)."""
    def rnd(v):
        return v.astype(ACT_DTYPE).astype(jnp.float32)

    def conv(v, wgt):
        return jax.lax.conv_general_dilated(
            v.astype(MXU_DTYPE), wgt.astype(MXU_DTYPE), (1, 1), "SAME",
            dimension_numbers=("NHWC", "HWIO", "NHWC"),
            preferred_element_type=jnp.float32)

    x = jnp.transpose(x_nchw, (0, 2, 3, 1)).astype(jnp.float32)
    x_stats = x                                   # f32 source of BN1 statistics
    for i, p in enumerate(blocks):
        cin, cout = x.shape[-1], int(p["conv2_sigma"].shape[-1])
        last = (i == len(blocks) - 1)

        mean1 = jnp.mean(x_stats, axis=(0, 1, 2), keepdims=True)
        var1 = jnp.mean((x_stats - mean1) ** 2, axis=(0, 1, 2), keepdims=True)
        a1 = jnp.maximum((x - mean1) * jax.lax.rsqrt(var1 + EPS)
                         * p["bn1_gamma"] + p["bn1_beta"], 0.0)

        h1 = conv(a1, p["conv1_sigma"] + p["conv1_phi"])               # f32
        if cin == cout:
            res = x
        else:
            res = rnd(conv(a1, p["short_sigma"] + p["short_phi"]))     # bf16 store

        mean2 = jnp.mean(h1, axis=(0, 1, 2), keepdims=True)            # f32 stats
        var2 = jnp.mean((h1 - mean2) ** 2, axis=(0, 1, 2), keepdims=True)
        h1s = rnd(h1)                                                   # bf16 store
        a2 = jnp.maximum((h1s - mean2) * jax.lax.rsqrt(var2 + EPS)
                         * p["bn2_gamma"] + p["bn2_beta"], 0.0)

        out = conv(a2, p["conv2_sigma"] + p["conv2_phi"]) + res
        x_stats = out
        x = out if last else rnd(out)
    return jnp.transpose(x, (0, 3, 1, 2))


# ------------------------------------ main ------------------------------------

def make_block_params(in_planes, out_planes, key):
    ks = jax.random.split(key, 7)
    w1 = 0.1 * jax.random.normal(ks[0], (3, 3, in_planes, out_planes), jnp.float32)
    w2 = 0.1 * jax.random.normal(ks[1], (3, 3, out_planes, out_planes), jnp.float32)
    p = dict(
        bn1_gamma=1.0 + 0.1 * jax.random.normal(ks[2], (in_planes,), jnp.float32),
        bn1_beta=0.1 * jax.random.normal(ks[3], (in_planes,), jnp.float32),
        bn2_gamma=1.0 + 0.1 * jax.random.normal(ks[4], (out_planes,), jnp.float32),
        bn2_beta=0.1 * jax.random.normal(ks[5], (out_planes,), jnp.float32),
        # DecConv2d: sigma = w/2, phi = w/2  => effective weight = sigma + phi.
        conv1_sigma=0.5 * w1, conv1_phi=0.5 * w1,
        conv2_sigma=0.5 * w2, conv2_phi=0.5 * w2,
    )
    if in_planes != out_planes:
        ws = 0.1 * jax.random.normal(ks[6], (1, 1, in_planes, out_planes),
                                     jnp.float32)
        p["short_sigma"], p["short_phi"] = 0.5 * ws, 0.5 * ws
    return p


if __name__ == "__main__":
    key = jax.random.PRNGKey(0)
    n, h, w = 2, 16, 16
    in_planes, out_planes, nb_layers = 4, 8, 2   # NetworkBlock(2, 4, 8, BasicBlock, 1, 0.0)

    keys = jax.random.split(key, 1 + nb_layers)
    blocks = []
    for i in range(nb_layers):
        cin = in_planes if i == 0 else out_planes
        blocks.append(make_block_params(cin, out_planes, keys[1 + i]))
    x = jax.random.normal(keys[0], (n, in_planes, h, w), jnp.float32)

    try:
        # Preferred path: grouped-K im2col matmuls (fewest accumulator passes).
        y = jax.block_until_ready(network_block_forward(x, blocks,
                                                        conv_mode="grouped"))
    except Exception:
        # Safety net: per-tap accumulation (no lane-dim concatenation), same math.
        y = jax.block_until_ready(network_block_forward(x, blocks,
                                                        conv_mode="per_tap"))

    r = ref_network_block(x, blocks)

    assert y.shape == (n, out_planes, h, w)
    max_err = float(jnp.max(jnp.abs(y - r)))
    assert jnp.allclose(y, r, atol=3e-3, rtol=3e-3), max_err
    print("KERNEL_OK")
</pallas_src>

<mosaic_0001>
module attributes {stable_mosaic.version = 11 : i64} {
  func.func @_bn_stats_kernel(%arg0: i32, %arg1: memref<2x256x4xf32, #tpu.memory_space<vmem>>, %arg2: memref<1x4xf32, #tpu.memory_space<vmem>>, %arg3: memref<1x4xf32, #tpu.memory_space<vmem>>, %arg4: memref<1x4xf32, #tpu.memory_space<vmem>>, %arg5: memref<1x4xf32, #tpu.memory_space<vmem>>, %arg6: memref<2x4xf32, #tpu.memory_space<vmem>>) attributes {dimension_semantics = [#tpu.dimension_semantics<arbitrary>], iteration_bounds = array<i64: 1>, scalar_prefetch = 0 : i64, scratch_operands = 1 : i64, tpu.core_type = #tpu.core_type<tc>, window_params = [{transform_indices = @transform_0, window_bounds = array<i64: 2, 256, 4>}, {pipeline_mode = #tpu.pipeline_mode<synchronous>, transform_indices = @transform_1, window_bounds = array<i64: 1, 4>}, {pipeline_mode = #tpu.pipeline_mode<synchronous>, transform_indices = @transform_2, window_bounds = array<i64: 1, 4>}, {pipeline_mode = #tpu.pipeline_mode<synchronous>, transform_indices = @transform_3, window_bounds = array<i64: 1, 4>}, {pipeline_mode = #tpu.pipeline_mode<synchronous>, transform_indices = @transform_4, window_bounds = array<i64: 1, 4>}]} {
    %c0 = arith.constant 0 : index
    %c0_0 = arith.constant 0 : index
    %c0_1 = arith.constant 0 : index
    %0 = vector.load %arg1[%c0, %c0_0, %c0_1] : memref<2x256x4xf32, #tpu.memory_space<vmem>>, vector<2x256x4xf32>
    %1 = vector.shape_cast %0 : vector<2x256x4xf32> to vector<512x4xf32>
    %c0_i32 = arith.constant 0 : i32
    %2 = arith.cmpi eq, %arg0, %c0_i32 : i32
    %3 = arith.extui %2 : i1 to i32
    %c0_i32_2 = arith.constant 0 : i32
    %4 = arith.cmpi ne, %3, %c0_i32_2 : i32
    scf.if %4 {
      %cst_13 = arith.constant 0.000000e+00 : f32
      %19 = vector.broadcast %cst_13 : f32 to vector<2x4xf32>
      %c0_14 = arith.constant 0 : index
      %c0_15 = arith.constant 0 : index
      %20 = vector.load %arg6[%c0_14, %c0_15] : memref<2x4xf32, #tpu.memory_space<vmem>>, vector<2x4xf32>
      tpu.vector_store %arg6[%c0_14, %c0_15], %19 {strides = array<i32>} : memref<2x4xf32, #tpu.memory_space<vmem>>, vector<2x4xf32>,
    } else {
    }
    %c0_3 = arith.constant 0 : index
    %c0_4 = arith.constant 0 : index
    %5 = vector.load %arg6[%c0_3, %c0_4] : memref<2x4xf32, #tpu.memory_space<vmem>>, vector<1x4xf32>
    %cst = arith.constant dense<0.000000e+00> : vector<4xf32>
    %6 = vector.multi_reduction <add>, %1, %cst [0] : vector<512x4xf32> to vector<4xf32>
    %7 = vector.shape_cast %6 : vector<4xf32> to vector<1x4xf32>
    %8 = arith.addf %5, %7 : vector<1x4xf32>
    %c0_5 = arith.constant 0 : index
    %c0_6 = arith.constant 0 : index
    %9 = vector.load %arg6[%c0_5, %c0_6] : memref<2x4xf32, #tpu.memory_space<vmem>>, vector<1x4xf32>
    tpu.vector_store %arg6[%c0_5, %c0_6], %8 {strides = array<i32>} : memref<2x4xf32, #tpu.memory_space<vmem>>, vector<1x4xf32>,
    %c1 = arith.constant 1 : index
    %c0_7 = arith.constant 0 : index
    %10 = vector.load %arg6[%c1, %c0_7] : memref<2x4xf32, #tpu.memory_space<vmem>>, vector<1x4xf32>
    %11 = arith.mulf %1, %1 : vector<512x4xf32>
    %cst_8 = arith.constant dense<0.000000e+00> : vector<4xf32>
    %12 = vector.multi_reduction <add>, %11, %cst_8 [0] : vector<512x4xf32> to vector<4xf32>
    %13 = vector.shape_cast %12 : vector<4xf32> to vector<1x4xf32>
    %14 = arith.addf %10, %13 : vector<1x4xf32>
    %c1_9 = arith.constant 1 : index
    %c0_10 = arith.constant 0 : index
    %15 = vector.load %arg6[%c1_9, %c0_10] : memref<2x4xf32, #tpu.memory_space<vmem>>, vector<1x4xf32>
    tpu.vector_store %arg6[%c1_9, %c0_10], %14 {strides = array<i32>} : memref<2x4xf32, #tpu.memory_space<vmem>>, vector<1x4xf32>,
    %c0_i32_11 = arith.constant 0 : i32
    %16 = arith.cmpi eq, %arg0, %c0_i32_11 : i32
    %17 = arith.extui %16 : i1 to i32
    %c0_i32_12 = arith.constant 0 : i32
    %18 = arith.cmpi ne, %17, %c0_i32_12 : i32
    scf.if %18 {
      %c0_13 = arith.constant 0 : index
      %c0_14 = arith.constant 0 : index
      %19 = vector.load %arg6[%c0_13, %c0_14] : memref<2x4xf32, #tpu.memory_space<vmem>>, vector<1x4xf32>
      %cst_15 = arith.constant 5.120000e+02 : f32
      %20 = vector.broadcast %cst_15 : f32 to vector<1x4xf32>
      %21 = arith.divf %19, %20 : vector<1x4xf32>
      %c1_16 = arith.constant 1 : index
      %c0_17 = arith.constant 0 : index
      %22 = vector.load %arg6[%c1_16, %c0_17] : memref<2x4xf32, #tpu.memory_space<vmem>>, vector<1x4xf32>
      %cst_18 = arith.constant 5.120000e+02 : f32
      %23 = vector.broadcast %cst_18 : f32 to vector<1x4xf32>
      %24 = arith.divf %22, %23 : vector<1x4xf32>
      %25 = arith.mulf %21, %21 : vector<1x4xf32>
      %26 = arith.subf %24, %25 : vector<1x4xf32>
      %cst_19 = arith.constant 9.99999974E-6 : f32
      %27 = vector.broadcast %cst_19 : f32 to vector<1x4xf32>
      %28 = arith.addf %26, %27 : vector<1x4xf32>
      %29 = math.rsqrt %28 : vector<1x4xf32>
      %c0_20 = arith.constant 0 : index
      %c0_21 = arith.constant 0 : index
      %30 = vector.load %arg2[%c0_20, %c0_21] : memref<1x4xf32, #tpu.memory_space<vmem>>, vector<1x4xf32>
      %31 = arith.mulf %30, %29 : vector<1x4xf32>
      %c0_22 = arith.constant 0 : index
      %c0_23 = arith.constant 0 : index
      %32 = vector.load %arg4[%c0_22, %c0_23] : memref<1x4xf32, #tpu.memory_space<vmem>>, vector<1x4xf32>
      tpu.vector_store %arg4[%c0_22, %c0_23], %31 {strides = array<i32>} : memref<1x4xf32, #tpu.memory_space<vmem>>, vector<1x4xf32>,
      %c0_24 = arith.constant 0 : index
      %c0_25 = arith.constant 0 : index
      %33 = vector.load %arg3[%c0_24, %c0_25] : memref<1x4xf32, #tpu.memory_space<vmem>>, vector<1x4xf32>
      %34 = arith.mulf %21, %31 : vector<1x4xf32>
      %35 = arith.subf %33, %34 : vector<1x4xf32>
      %c0_26 = arith.constant 0 : index
      %c0_27 = arith.constant 0 : index
      %36 = vector.load %arg5[%c0_26, %c0_27] : memref<1x4xf32, #tpu.memory_space<vmem>>, vector<1x4xf32>
      tpu.vector_store %arg5[%c0_26, %c0_27], %35 {strides = array<i32>} : memref<1x4xf32, #tpu.memory_space<vmem>>, vector<1x4xf32>,
    } else {
    }
    return
  }
  func.func @transform_0(%arg0: i32) -> (i32, i32, i32) {
    %c0_i32 = arith.constant 0 : i32
    %c0_i32_0 = arith.constant 0 : i32
    %c0_i32_1 = arith.constant 0 : i32
    return %arg0, %c0_i32, %c0_i32_0 : i32, i32, i32
  }
  func.func @transform_1(%arg0: i32) -> (i32, i32) {
    %c0_i32 = arith.constant 0 : i32
    %c0_i32_0 = arith.constant 0 : i32
    %c0_i32_1 = arith.constant 0 : i32
    return %c0_i32, %c0_i32_0 : i32, i32
  }
  func.func @transform_2(%arg0: i32) -> (i32, i32) {
    %c0_i32 = arith.constant 0 : i32
    %c0_i32_0 = arith.constant 0 : i32
    %c0_i32_1 = arith.constant 0 : i32
    return %c0_i32, %c0_i32_0 : i32, i32
  }
  func.func @transform_3(%arg0: i32) -> (i32, i32) {
    %c0_i32 = arith.constant 0 : i32
    %c0_i32_0 = arith.constant 0 : i32
    %c0_i32_1 = arith.constant 0 : i32
    return %c0_i32, %c0_i32_0 : i32, i32
  }
  func.func @transform_4(%arg0: i32) -> (i32, i32) {
    %c0_i32 = arith.constant 0 : i32
    %c0_i32_0 = arith.constant 0 : i32
    %c0_i32_1 = arith.constant 0 : i32
    return %c0_i32, %c0_i32_0 : i32, i32
  }
}

module attributes {stable_mosaic.version = 11 : i64} {
  func.func @_bn_stats_kernel(%arg0: i32, %arg1: memref<2x256x4xf32, #tpu.memory_space<vmem>>, %arg2: memref<1x4xf32, #tpu.memory_space<vmem>>, %arg3: memref<1x4xf32, #tpu.memory_space<vmem>>, %arg4: memref<1x4xf32, #tpu.memory_space<vmem>>, %arg5: memref<1x4xf32, #tpu.memory_space<vmem>>, %arg6: memref<2x4xf32, #tpu.memory_space<vmem>>) attributes {dimension_semantics = [#tpu.dimension_semantics<arbitrary>], iteration_bounds = array<i64: 1>, scalar_prefetch = 0 : i64, scratch_operands = 1 : i64, tpu.core_type = #tpu.core_type<tc>, window_params = [{transform_indices = @transform_0, window_bounds = array<i64: 2, 256, 4>}, {pipeline_mode = #tpu.pipeline_mode<synchronous>, transform_indices = @transform_1, window_bounds = array<i64: 1, 4>}, {pipeline_mode = #tpu.pipeline_mode<synchronous>, transform_indices = @transform_2, window_bounds = array<i64: 1, 4>}, {pipeline_mode = #tpu.pipeline_mode<synchronous>, transform_indices = @transform_3, window_bounds = array<i64: 1, 4>}, {pipeline_mode = #tpu.pipeline_mode<synchronous>, transform_indices = @transform_4, window_bounds = array<i64: 1, 4>}]} {
    %c0 = arith.constant 0 : index
    %c0_0 = arith.constant 0 : index
    %c0_1 = arith.constant 0 : index
    %0 = vector.load %arg1[%c0, %c0_0, %c0_1] : memref<2x256x4xf32, #tpu.memory_space<vmem>>, vector<2x256x4xf32>
    %1 = vector.shape_cast %0 : vector<2x256x4xf32> to vector<512x4xf32>
    %c0_i32 = arith.constant 0 : i32
    %2 = arith.cmpi eq, %arg0, %c0_i32 : i32
    %3 = arith.extui %2 : i1 to i32
    %c0_i32_2 = arith.constant 0 : i32
    %4 = arith.cmpi ne, %3, %c0_i32_2 : i32
    scf.if %4 {
      %cst_13 = arith.constant 0.000000e+00 : f32
      %19 = vector.broadcast %cst_13 : f32 to vector<2x4xf32>
      %c0_14 = arith.constant 0 : index
      %c0_15 = arith.constant 0 : index
      %20 = vector.load %arg6[%c0_14, %c0_15] : memref<2x4xf32, #tpu.memory_space<vmem>>, vector<2x4xf32>
      tpu.vector_store %arg6[%c0_14, %c0_15], %19 {strides = array<i32>} : memref<2x4xf32, #tpu.memory_space<vmem>>, vector<2x4xf32>,
    } else {
    }
    %c0_3 = arith.constant 0 : index
    %c0_4 = arith.constant 0 : index
    %5 = vector.load %arg6[%c0_3, %c0_4] : memref<2x4xf32, #tpu.memory_space<vmem>>, vector<1x4xf32>
    %cst = arith.constant dense<0.000000e+00> : vector<4xf32>
    %6 = vector.multi_reduction <add>, %1, %cst [0] : vector<512x4xf32> to vector<4xf32>
    %7 = vector.shape_cast %6 : vector<4xf32> to vector<1x4xf32>
    %8 = arith.addf %5, %7 : vector<1x4xf32>
    %c0_5 = arith.constant 0 : index
    %c0_6 = arith.constant 0 : index
    %9 = vector.load %arg6[%c0_5, %c0_6] : memref<2x4xf32, #tpu.memory_space<vmem>>, vector<1x4xf32>
    tpu.vector_store %arg6[%c0_5, %c0_6], %8 {strides = array<i32>} : memref<2x4xf32, #tpu.memory_space<vmem>>, vector<1x4xf32>,
    %c1 = arith.constant 1 : index
    %c0_7 = arith.constant 0 : index
    %10 = vector.load %arg6[%c1, %c0_7] : memref<2x4xf32, #tpu.memory_space<vmem>>, vector<1x4xf32>
    %11 = arith.mulf %1, %1 : vector<512x4xf32>
    %cst_8 = arith.constant dense<0.000000e+00> : vector<4xf32>
    %12 = vector.multi_reduction <add>, %11, %cst_8 [0] : vector<512x4xf32> to vector<4xf32>
    %13 = vector.shape_cast %12 : vector<4xf32> to vector<1x4xf32>
    %14 = arith.addf %10, %13 : vector<1x4xf32>
    %c1_9 = arith.constant 1 : index
    %c0_10 = arith.constant 0 : index
    %15 = vector.load %arg6[%c1_9, %c0_10] : memref<2x4xf32, #tpu.memory_space<vmem>>, vector<1x4xf32>
    tpu.vector_store %arg6[%c1_9, %c0_10], %14 {strides = array<i32>} : memref<2x4xf32, #tpu.memory_space<vmem>>, vector<1x4xf32>,
    %c0_i32_11 = arith.constant 0 : i32
    %16 = arith.cmpi eq, %arg0, %c0_i32_11 : i32
    %17 = arith.extui %16 : i1 to i32
    %c0_i32_12 = arith.constant 0 : i32
    %18 = arith.cmpi ne, %17, %c0_i32_12 : i32
    scf.if %18 {
      %c0_13 = arith.constant 0 : index
      %c0_14 = arith.constant 0 : index
      %19 = vector.load %arg6[%c0_13, %c0_14] : memref<2x4xf32, #tpu.memory_space<vmem>>, vector<1x4xf32>
      %cst_15 = arith.constant 5.120000e+02 : f32
      %20 = vector.broadcast %cst_15 : f32 to vector<1x4xf32>
      %21 = arith.divf %19, %20 : vector<1x4xf32>
      %c1_16 = arith.constant 1 : index
      %c0_17 = arith.constant 0 : index
      %22 = vector.load %arg6[%c1_16, %c0_17] : memref<2x4xf32, #tpu.memory_space<vmem>>, vector<1x4xf32>
      %cst_18 = arith.constant 5.120000e+02 : f32
      %23 = vector.broadcast %cst_18 : f32 to vector<1x4xf32>
      %24 = arith.divf %22, %23 : vector<1x4xf32>
      %25 = arith.mulf %21, %21 : vector<1x4xf32>
      %26 = arith.subf %24, %25 : vector<1x4xf32>
      %cst_19 = arith.constant 9.99999974E-6 : f32
      %27 = vector.broadcast %cst_19 : f32 to vector<1x4xf32>
      %28 = arith.addf %26, %27 : vector<1x4xf32>
      %29 = math.rsqrt %28 : vector<1x4xf32>
      %c0_20 = arith.constant 0 : index
      %c0_21 = arith.constant 0 : index
      %30 = vector.load %arg2[%c0_20, %c0_21] : memref<1x4xf32, #tpu.memory_space<vmem>>, vector<1x4xf32>
      %31 = arith.mulf %30, %29 : vector<1x4xf32>
      %c0_22 = arith.constant 0 : index
      %c0_23 = arith.constant 0 : index
      %32 = vector.load %arg4[%c0_22, %c0_23] : memref<1x4xf32, #tpu.memory_space<vmem>>, vector<1x4xf32>
      tpu.vector_store %arg4[%c0_22, %c0_23], %31 {strides = array<i32>} : memref<1x4xf32, #tpu.memory_space<vmem>>, vector<1x4xf32>,
      %c0_24 = arith.constant 0 : index
      %c0_25 = arith.constant 0 : index
      %33 = vector.load %arg3[%c0_24, %c0_25] : memref<1x4xf32, #tpu.memory_space<vmem>>, vector<1x4xf32>
      %34 = arith.mulf %21, %31 : vector<1x4xf32>
      %35 = arith.subf %33, %34 : vector<1x4xf32>
      %c0_26 = arith.constant 0 : index
      %c0_27 = arith.constant 0 : index
      %36 = vector.load %arg5[%c0_26, %c0_27] : memref<1x4xf32, #tpu.memory_space<vmem>>, vector<1x4xf32>
      tpu.vector_store %arg5[%c0_26, %c0_27], %35 {strides = array<i32>} : memref<1x4xf32, #tpu.memory_space<vmem>>, vector<1x4xf32>,
    } else {
    }
    return
  }
  func.func @transform_0(%arg0: i32) -> (i32, i32, i32) {
    %c0_i32 = arith.constant 0 : i32
    %c0_i32_0 = arith.constant 0 : i32
    %c0_i32_1 = arith.constant 0 : i32
    return %arg0, %c0_i32, %c0_i32_0 : i32, i32, i32
  }
  func.func @transform_1(%arg0: i32) -> (i32, i32) {
    %c0_i32 = arith.constant 0 : i32
    %c0_i32_0 = arith.constant 0 : i32
    %c0_i32_1 = arith.constant 0 : i32
    return %c0_i32, %c0_i32_0 : i32, i32
  }
  func.func @transform_2(%arg0: i32) -> (i32, i32) {
    %c0_i32 = arith.constant 0 : i32
    %c0_i32_0 = arith.constant 0 : i32
    %c0_i32_1 = arith.constant 0 : i32
    return %c0_i32, %c0_i32_0 : i32, i32
  }
  func.func @transform_3(%arg0: i32) -> (i32, i32) {
    %c0_i32 = arith.constant 0 : i32
    %c0_i32_0 = arith.constant 0 : i32
    %c0_i32_1 = arith.constant 0 : i32
    return %c0_i32, %c0_i32_0 : i32, i32
  }
  func.func @transform_4(%arg0: i32) -> (i32, i32) {
    %c0_i32 = arith.constant 0 : i32
    %c0_i32_0 = arith.constant 0 : i32
    %c0_i32_1 = arith.constant 0 : i32
    return %c0_i32, %c0_i32_0 : i32, i32
  }
}

</mosaic_0001>

<bundles_post_ra>
// kernel: tpu_custom_call.1
= control target key start
LH: loop header
LB: loop body
LE: loop exit
PB: predicated region body
PF: predicated region fallthrough
CT: control target
= control target key end

     0   :  { %10 = vsyncpa [#allocation4], 0  ;;  %vm86_vm0 = vcmask 25600   ;;  %vm89_vm1 = vcmask 31744   ;;  %v526_v3 = vmov 0.0   ;;  %s1203_s0 = inlined_call_operand.vmem [shape: f32[2,256,4], index: 0, kind: input, shape index: {}]   ;;  %s1204_s1 = inlined_call_operand.vmem [shape: f32[1,4], index: 1, kind: input, shape index: {}]   ;;  %s1205_s2 = inlined_call_operand.vmem [shape: f32[1,4], index: 2, kind: input, shape index: {}]   ;;  %s1206_s3 = inlined_call_operand.hbm [shape: f32[1,4], index: 3, kind: output, shape index: {0}]   ;;  %s1207_s4 = inlined_call_operand.hbm [shape: f32[1,4], index: 4, kind: output, shape index: {1}]  }
   0x1   :  { %v18_v0 = vld [vmem:[%s1203_s0] sm:$0xff]  ;;  %v19_v1 = vld [vmem:[%s1203_s0 + $0x8] sm:$0xff]  ;;  %v20_v2 = vld [vmem:[%s1203_s0 + $0x10] sm:$0xff]  ;;  %87 = vst.msk [vmem:[#allocation2] sm:$0x3] %vm86_vm0, %v526_v3 }
   0x2   :  { %v21_v4 = vld [vmem:[%s1203_s0 + $0x18] sm:$0xff]  ;;  %v90_v5 = vsel %vm89_vm1, %v18_v0, 0.0  ;;  %v91_v6 = vsel %vm89_vm1, %v19_v1, 0.0  ;;  %v93_v7 = vsel %vm89_vm1, %v20_v2, 0.0  ;;  %v22_v8 = vld [vmem:[%s1203_s0 + $0x20] sm:$0xff]  ;;  %v576_v11 = vld [vmem:[%s1203_s0 + $0x28] sm:$0xff] }
   0x3   :  { %v92_v9 = vadd.f32 %v91_v6, %v90_v5  ;;  %v95_v10 = vsel %vm89_vm1, %v21_v4, 0.0  ;;  %v97_v13 = vsel %vm89_vm1, %v22_v8, 0.0  ;;  %v582_v14 = vld [vmem:[%s1203_s0 + $0x30] sm:$0xff]  ;;  %v99_v16 = vsel %vm89_vm1, %v576_v11, 0.0  ;;  %v589_v17 = vld [vmem:[%s1203_s0 + $0x38] sm:$0xff]  ;;  %v596_v20 = vld [vmem:[%s1203_s0 + $0x40] sm:$0xff] }
   0x4   :  { %v101_v19 = vsel %vm89_vm1, %v582_v14, 0.0  ;;  %v103_v22 = vsel %vm89_vm1, %v589_v17, 0.0  ;;  %v603_v23 = vld [vmem:[%s1203_s0 + $0x48] sm:$0xff]  ;;  %v105_v25 = vsel %vm89_vm1, %v596_v20, 0.0  ;;  %v610_v26 = vld [vmem:[%s1203_s0 + $0x50] sm:$0xff]  ;;  %v617_v29 = vld [vmem:[%s1203_s0 + $0x58] sm:$0xff] }
   0x5   :  { %v94_v12 = vadd.f32 %v93_v7, %v92_v9  ;;  %v107_v28 = vsel %vm89_vm1, %v603_v23, 0.0  ;;  %v109_v31 = vsel %vm89_vm1, %v610_v26, 0.0  ;;  %v624_v32 = vld [vmem:[%s1203_s0 + $0x60] sm:$0xff]  ;;  %v111_v34 = vsel %vm89_vm1, %v617_v29, 0.0  ;;  %v631_v35 = vld [vmem:[%s1203_s0 + $0x68] sm:$0xff]  ;;  %v638_v38 = vld [vmem:[%s1203_s0 + $0x70] sm:$0xff] }
   0x6   :  { %v113_v37 = vsel %vm89_vm1, %v624_v32, 0.0 }
   0x7   :  { %v96_v15 = vadd.f32 %v95_v10, %v94_v12 }
   0x9   :  { %v98_v18 = vadd.f32 %v97_v13, %v96_v15 }
   0xb   :  { %v100_v21 = vadd.f32 %v99_v16, %v98_v18 }
   0xd   :  { %v102_v24 = vadd.f32 %v101_v19, %v100_v21 }
   0xf   :  { %v104_v27 = vadd.f32 %v103_v22, %v102_v24 }
  0x11   :  { %v106_v30 = vadd.f32 %v105_v25, %v104_v27 }
  0x13   :  { %v108_v33 = vadd.f32 %v107_v28, %v106_v30 }
  0x15   :  { %v110_v36 = vadd.f32 %v109_v31, %v108_v33 }
  0x17   :  { %v112_v39 = vadd.f32 %v111_v34, %v110_v36 }
  0x18   :  { %11 = vsyncpa [#allocation6], 0  ;;  %v115_v40 = vsel %vm89_vm1, %v631_v35, 0.0  ;;  %v645_v41 = vld [vmem:[%s1203_s0 + $0x78] sm:$0xff]  ;;  %v117_v43 = vsel %vm89_vm1, %v638_v38, 0.0  ;;  %v652_v44 = vld [vmem:[%s1203_s0 + $0x80] sm:$0xff]  ;;  %v227_v56 = vmul.f32 %v18_v0, %v18_v0  ;;  %v228_v59 = vmul.f32 %v19_v1, %v19_v1 }
  0x19   :  { %v114_v42 = vadd.f32 %v113_v37, %v112_v39  ;;  %v119_v46 = vsel %vm89_vm1, %v645_v41, 0.0  ;;  %v659_v47 = vld [vmem:[%s1203_s0 + $0x88] sm:$0xff]  ;;  %v121_v49 = vsel %vm89_vm1, %v652_v44, 0.0  ;;  %v666_v50 = vld [vmem:[%s1203_s0 + $0x90] sm:$0xff]  ;;  %v673_v53 = vld [vmem:[%s1203_s0 + $0x98] sm:$0xff]  ;;  %v229_v60 = vmul.f32 %v20_v2, %v20_v2  ;;  %s527_s14 = smov [#allocation3]  }
  0x1a   :  { %v123_v52 = vsel %vm89_vm1, %v659_v47, 0.0  ;;  %v125_v55 = vsel %vm89_vm1, %v666_v50, 0.0  ;;  %v680_v57 = vld [vmem:[%s1203_s0 + $0xa0] sm:$0xff]  ;;  %v127_v61 = vsel %vm89_vm1, %v673_v53, 0.0  ;;  %v687_v62 = vld [vmem:[%s1203_s0 + $0xa8] sm:$0xff]  ;;  %v230_v3 = vmul.f32 %v21_v4, %v21_v4  ;;  %v695_v1 = vld [vmem:[%s1203_s0 + $0xb0] sm:$0xff] }
  0x1b   :  { %v116_v45 = vadd.f32 %v115_v40, %v114_v42  ;;  %v129_v0 = vsel %vm89_vm1, %v680_v57, 0.0  ;;  %v291_v5 = vsel %vm89_vm1, %v227_v56, 0.0  ;;  %v231_v6 = vmul.f32 %v22_v8, %v22_v8  ;;  %v704_v12 = vld [vmem:[%s1203_s0 + $0xb8] sm:$0xff]  ;;  %v714_v19 = vld [vmem:[%s1203_s0 + $0xc0] sm:$0xff]  ;;  %v724_v27 = vld [vmem:[%s1203_s0 + $0xc8] sm:$0xff]  ;;  %s451_s15 = sshll.u32 %s527_s14, 4  ;;  %s452_s15 = int_to_ptr.vmem [resolvable:$true] %s451_s15 }
  0x1c   :  { %v292_v7 = vsel %vm89_vm1, %v228_v59, 0.0  ;;  %v294_v9 = vsel %vm89_vm1, %v229_v60, 0.0  ;;  %v131_v10 = vsel %vm89_vm1, %v687_v62, 0.0  ;;  %v232_v15 = vmul.f32 %v576_v11, %v576_v11  ;;  %v734_v34 = vld [vmem:[%s1203_s0 + $0xd0] sm:$0xff]  ;;  %v744_v42 = vld [vmem:[%s1203_s0 + $0xd8] sm:$0xff]  ;;  %v764_v56 = vld [vmem:[%s1203_s0 + $0xe8] sm:$0xff]  ;;  %p483_p1 = scmp.lt.s32.totalorder %s452_s15, %s452_s15 }
  0x1d   :  { %v118_v48 = vadd.f32 %v117_v43, %v116_v45  ;;  %v293_v4 = vadd.f32 %v292_v7, %v291_v5  ;;  %v296_v16 = vsel %vm89_vm1, %v230_v3, 0.0  ;;  %v133_v8 = vsel %vm89_vm1, %v695_v1, 0.0  ;;  %s528_s18 = smov [#allocation5]   ;;  %s478_s20 = scalar_lea.vmem %s452_s15, 16 }
  0x1e   :  { %v233_v22 = vmul.f32 %v582_v14, %v582_v14  ;;  %v298_v24 = vsel %vm89_vm1, %v231_v6, 0.0  ;;  %v135_v11 = vsel %vm89_vm1, %v704_v12, 0.0  ;;  %v234_v30 = vmul.f32 %v589_v17, %v589_v17  ;;  %v784_v6 = vld [vmem:[%s1203_s0 + $0xf8] sm:$0xff]  ;;  %s461_s19 = sshll.u32 %s528_s18, 4  ;;  %p479_p0 = scmp.ne.s32.totalorder %s452_s15, %s478_s20  ;;  %s462_s19 = int_to_ptr.vmem [resolvable:$true] %s461_s19 }
  0x1f   :  { %v120_v51 = vadd.f32 %v119_v46, %v118_v48  ;;  %v295_v18 = vadd.f32 %v294_v9, %v293_v4  ;;  %v300_v31 = vsel %vm89_vm1, %v232_v15, 0.0  ;;  %v137_v14 = vsel %vm89_vm1, %v714_v19, 0.0  ;;  %s482_s21 = scalar_lea.vmem %s452_s15, 32 }
  0x20   :  { %v235_v37 = vmul.f32 %v596_v20, %v596_v20  ;;  %v302_v39 = vsel %vm89_vm1, %v233_v22, 0.0  ;;  %v139_v17 = vsel %vm89_vm1, %v724_v27, 0.0  ;;  %v236_v45 = vmul.f32 %v603_v23, %v603_v23  ;;  %p484_p2 = scmp.lt.s32.totalorder %s482_s21, %s478_s20 }
  0x21   :  { %v122_v54 = vadd.f32 %v121_v49, %v120_v51  ;;  %v297_v25 = vadd.f32 %v296_v16, %v295_v18  ;;  %v304_v46 = vsel %vm89_vm1, %v234_v30, 0.0  ;;  %v141_v20 = vsel %vm89_vm1, %v734_v34, 0.0  ;;  %v754_v49 = vld [vmem:[%s1203_s0 + $0xe0] sm:$0xff] }
  0x22   :  { %v143_v23 = vsel %vm89_vm1, %v744_v42, 0.0  ;;  %v238_v59 = vmul.f32 %v617_v29, %v617_v29  ;;  %v308_v60 = vsel %vm89_vm1, %v236_v45, 0.0  ;;  %v147_v29 = vsel %vm89_vm1, %v764_v56, 0.0  ;;  %p485_p3 = por %p484_p2, %p483_p1 }
  0x23   :  { %v124_v58 = vadd.f32 %v123_v52, %v122_v54  ;;  %v299_v33 = vadd.f32 %v298_v24, %v297_v25  ;;  %v237_v52 = vmul.f32 %v610_v26, %v610_v26  ;;  %v306_v54 = vsel %vm89_vm1, %v235_v37, 0.0 }
  0x24   :  { %v145_v26 = vsel %vm89_vm1, %v754_v49, 0.0  ;;  %v240_v9 = vmul.f32 %v631_v35, %v631_v35  ;;  %v241_v16 = vmul.f32 %v638_v38, %v638_v38  ;;  %v151_v35 = vsel %vm89_vm1, %v784_v6, 0.0  ;;  %p486_p4 = pnand %p485_p3, %p479_p0 }
  0x25   :  { %v126_v63 = vadd.f32 %v125_v55, %v124_v58  ;;  %v301_v40 = vadd.f32 %v300_v31, %v299_v33  ;;  %v310_v5 = vsel %vm89_vm1, %v237_v52, 0.0  ;;  %v242_v24 = vmul.f32 %v645_v41, %v645_v41 }
  0x26   :  { %v243_v31 = vmul.f32 %v652_v44, %v652_v44  ;;  %vm224_vm2 = vcmask 24576  }
  0x27   :  { %v128_v2 = vadd.f32 %v127_v61, %v126_v63  ;;  %v303_v48 = vadd.f32 %v302_v39, %v301_v40  ;;  %v774_v63 = vld [vmem:[%s1203_s0 + $0xf0] sm:$0xff]  ;;  %v244_v39 = vmul.f32 %v659_v47, %v659_v47 }
  0x29   :  { %v130_v13 = vadd.f32 %v129_v0, %v128_v2  ;;  %v305_v55 = vadd.f32 %v304_v46, %v303_v48  ;;  %v239_v0 = vmul.f32 %v624_v32, %v624_v32  ;;  %v149_v32 = vsel %vm89_vm1, %v774_v63, 0.0 }
  0x2a   :  { %v245_v46 = vmul.f32 %v666_v50, %v666_v50 }
  0x2b   :  { %v132_v21 = vadd.f32 %v131_v10, %v130_v13  ;;  %v307_v61 = vadd.f32 %v306_v54, %v305_v55  ;;  %v312_v10 = vsel %vm89_vm1, %v238_v59, 0.0  ;;  %v794_v13 = vld [vmem:[%s1203_s0 + $0x100] sm:$0xff]  ;;  %v246_v54 = vmul.f32 %v673_v53, %v673_v53 }
  0x2c   :  { %v153_v38 = vsel %vm89_vm1, %v794_v13, 0.0 }
  0x2d   :  { %v134_v28 = vadd.f32 %v133_v8, %v132_v21  ;;  %v309_v2 = vadd.f32 %v308_v60, %v307_v61  ;;  %v314_v8 = vsel %vm89_vm1, %v239_v0, 0.0  ;;  %v804_v21 = vld [vmem:[%s1203_s0 + $0x108] sm:$0xff]  ;;  %v247_v60 = vmul.f32 %v680_v57, %v680_v57 }
  0x2e   :  { %v155_v41 = vsel %vm89_vm1, %v804_v21, 0.0 }
  0x2f   :  { %v136_v36 = vadd.f32 %v135_v11, %v134_v28  ;;  %v311_v4 = vadd.f32 %v310_v5, %v309_v2  ;;  %v316_v11 = vsel %vm89_vm1, %v240_v9, 0.0  ;;  %v814_v28 = vld [vmem:[%s1203_s0 + $0x110] sm:$0xff]  ;;  %v248_v5 = vmul.f32 %v687_v62, %v687_v62 }
  0x30   :  { %v157_v44 = vsel %vm89_vm1, %v814_v28, 0.0 }
  0x31   :  { %v138_v43 = vadd.f32 %v137_v14, %v136_v36  ;;  %v313_v18 = vadd.f32 %v312_v10, %v311_v4  ;;  %v318_v14 = vsel %vm89_vm1, %v241_v16, 0.0  ;;  %v824_v36 = vld [vmem:[%s1203_s0 + $0x118] sm:$0xff]  ;;  %v249_v10 = vmul.f32 %v695_v1, %v695_v1 }
  0x32   :  { %v159_v47 = vsel %vm89_vm1, %v824_v36, 0.0 }
  0x33   :  { %v140_v51 = vadd.f32 %v139_v17, %v138_v43  ;;  %v315_v25 = vadd.f32 %v314_v8, %v313_v18  ;;  %v320_v17 = vsel %vm89_vm1, %v242_v24, 0.0  ;;  %v834_v43 = vld [vmem:[%s1203_s0 + $0x120] sm:$0xff]  ;;  %v250_v8 = vmul.f32 %v704_v12, %v704_v12 }
  0x34   :  { %v161_v50 = vsel %vm89_vm1, %v834_v43, 0.0 }
  0x35   :  { %v142_v58 = vadd.f32 %v141_v20, %v140_v51  ;;  %v317_v33 = vadd.f32 %v316_v11, %v315_v25  ;;  %v322_v20 = vsel %vm89_vm1, %v243_v31, 0.0  ;;  %v844_v51 = vld [vmem:[%s1203_s0 + $0x128] sm:$0xff]  ;;  %v251_v11 = vmul.f32 %v714_v19, %v714_v19 }
  0x36   :  { %v163_v53 = vsel %vm89_vm1, %v844_v51, 0.0 }
  0x37   :  { %v144_v3 = vadd.f32 %v143_v23, %v142_v58  ;;  %v319_v40 = vadd.f32 %v318_v14, %v317_v33  ;;  %v324_v23 = vsel %vm89_vm1, %v244_v39, 0.0  ;;  %v854_v58 = vld [vmem:[%s1203_s0 + $0x130] sm:$0xff]  ;;  %v252_v14 = vmul.f32 %v724_v27, %v724_v27 }
  0x38   :  { %v165_v57 = vsel %vm89_vm1, %v854_v58, 0.0 }
  0x39   :  { %v146_v7 = vadd.f32 %v145_v26, %v144_v3  ;;  %v321_v48 = vadd.f32 %v320_v17, %v319_v40  ;;  %v326_v26 = vsel %vm89_vm1, %v245_v46, 0.0  ;;  %v864_v3 = vld [vmem:[%s1203_s0 + $0x138] sm:$0xff]  ;;  %v253_v17 = vmul.f32 %v734_v34, %v734_v34 }
  0x3a   :  { %v167_v62 = vsel %vm89_vm1, %v864_v3, 0.0 }
  0x3b   :  { %v148_v15 = vadd.f32 %v147_v29, %v146_v7  ;;  %v323_v55 = vadd.f32 %v322_v20, %v321_v48  ;;  %v328_v29 = vsel %vm89_vm1, %v246_v54, 0.0  ;;  %v874_v7 = vld [vmem:[%s1203_s0 + $0x140] sm:$0xff]  ;;  %v254_v20 = vmul.f32 %v744_v42, %v744_v42 }
  0x3c   :  { %v169_v1 = vsel %vm89_vm1, %v874_v7, 0.0 }
  0x3d   :  { %v150_v22 = vadd.f32 %v149_v32, %v148_v15  ;;  %v325_v61 = vadd.f32 %v324_v23, %v323_v55  ;;  %v330_v32 = vsel %vm89_vm1, %v247_v60, 0.0  ;;  %v884_v15 = vld [vmem:[%s1203_s0 + $0x148] sm:$0xff]  ;;  %v255_v23 = vmul.f32 %v754_v49, %v754_v49 }
  0x3e   :  { %v171_v12 = vsel %vm89_vm1, %v884_v15, 0.0 }
  0x3f   :  { %v152_v30 = vadd.f32 %v151_v35, %v150_v22  ;;  %v327_v2 = vadd.f32 %v326_v26, %v325_v61  ;;  %v332_v35 = vsel %vm89_vm1, %v248_v5, 0.0  ;;  %v894_v22 = vld [vmem:[%s1203_s0 + $0x150] sm:$0xff]  ;;  %v256_v26 = vmul.f32 %v764_v56, %v764_v56 }
  0x40   :  { %v173_v19 = vsel %vm89_vm1, %v894_v22, 0.0 }
  0x41   :  { %v154_v37 = vadd.f32 %v153_v38, %v152_v30  ;;  %v329_v4 = vadd.f32 %v328_v29, %v327_v2  ;;  %v334_v38 = vsel %vm89_vm1, %v249_v10, 0.0  ;;  %v904_v30 = vld [vmem:[%s1203_s0 + $0x158] sm:$0xff]  ;;  %v257_v29 = vmul.f32 %v774_v63, %v774_v63 }
  0x42   :  { %v175_v27 = vsel %vm89_vm1, %v904_v30, 0.0 }
  0x43   :  { %v156_v45 = vadd.f32 %v155_v41, %v154_v37  ;;  %v331_v18 = vadd.f32 %v330_v32, %v329_v4  ;;  %v336_v41 = vsel %vm89_vm1, %v250_v8, 0.0  ;;  %v914_v37 = vld [vmem:[%s1203_s0 + $0x160] sm:$0xff]  ;;  %v258_v32 = vmul.f32 %v784_v6, %v784_v6 }
  0x44   :  { %v177_v34 = vsel %vm89_vm1, %v914_v37, 0.0 }
  0x45   :  { %v158_v52 = vadd.f32 %v157_v44, %v156_v45  ;;  %v333_v25 = vadd.f32 %v332_v35, %v331_v18  ;;  %v338_v44 = vsel %vm89_vm1, %v251_v11, 0.0  ;;  %v924_v45 = vld [vmem:[%s1203_s0 + $0x168] sm:$0xff]  ;;  %v259_v35 = vmul.f32 %v794_v13, %v794_v13 }
  0x46   :  { %v179_v42 = vsel %vm89_vm1, %v924_v45, 0.0 }
  0x47   :  { %v160_v59 = vadd.f32 %v159_v47, %v158_v52  ;;  %v335_v33 = vadd.f32 %v334_v38, %v333_v25  ;;  %v340_v47 = vsel %vm89_vm1, %v252_v14, 0.0  ;;  %v934_v52 = vld [vmem:[%s1203_s0 + $0x170] sm:$0xff]  ;;  %v260_v38 = vmul.f32 %v804_v21, %v804_v21 }
  0x48   :  { %v181_v49 = vsel %vm89_vm1, %v934_v52, 0.0 }
  0x49   :  { %v162_v0 = vadd.f32 %v161_v50, %v160_v59  ;;  %v337_v40 = vadd.f32 %v336_v41, %v335_v33  ;;  %v342_v50 = vsel %vm89_vm1, %v253_v17, 0.0  ;;  %v944_v59 = vld [vmem:[%s1203_s0 + $0x178] sm:$0xff]  ;;  %v261_v41 = vmul.f32 %v814_v28, %v814_v28 }
  0x4a   :  { %v183_v56 = vsel %vm89_vm1, %v944_v59, 0.0 }
  0x4b   :  { %v164_v9 = vadd.f32 %v163_v53, %v162_v0  ;;  %v339_v48 = vadd.f32 %v338_v44, %v337_v40  ;;  %v344_v53 = vsel %vm89_vm1, %v254_v20, 0.0  ;;  %v954_v0 = vld [vmem:[%s1203_s0 + $0x180] sm:$0xff]  ;;  %v262_v44 = vmul.f32 %v824_v36, %v824_v36 }
  0x4c   :  { %v185_v63 = vsel %vm89_vm1, %v954_v0, 0.0 }
  0x4d   :  { %v166_v16 = vadd.f32 %v165_v57, %v164_v9  ;;  %v341_v55 = vadd.f32 %v340_v47, %v339_v48  ;;  %v346_v57 = vsel %vm89_vm1, %v255_v23, 0.0  ;;  %v964_v9 = vld [vmem:[%s1203_s0 + $0x188] sm:$0xff]  ;;  %v263_v47 = vmul.f32 %v834_v43, %v834_v43 }
  0x4e   :  { %v187_v6 = vsel %vm89_vm1, %v964_v9, 0.0 }
  0x4f   :  { %v168_v24 = vadd.f32 %v167_v62, %v166_v16  ;;  %v343_v61 = vadd.f32 %v342_v50, %v341_v55  ;;  %v348_v62 = vsel %vm89_vm1, %v256_v26, 0.0  ;;  %v974_v16 = vld [vmem:[%s1203_s0 + $0x190] sm:$0xff]  ;;  %v264_v50 = vmul.f32 %v844_v51, %v844_v51 }
  0x50   :  { %v189_v13 = vsel %vm89_vm1, %v974_v16, 0.0 }
  0x51   :  { %v170_v31 = vadd.f32 %v169_v1, %v168_v24  ;;  %v345_v2 = vadd.f32 %v344_v53, %v343_v61  ;;  %v350_v1 = vsel %vm89_vm1, %v257_v29, 0.0  ;;  %v984_v24 = vld [vmem:[%s1203_s0 + $0x198] sm:$0xff]  ;;  %v265_v53 = vmul.f32 %v854_v58, %v854_v58 }
  0x52   :  { %v191_v21 = vsel %vm89_vm1, %v984_v24, 0.0 }
  0x53   :  { %v172_v39 = vadd.f32 %v171_v12, %v170_v31  ;;  %v347_v4 = vadd.f32 %v346_v57, %v345_v2  ;;  %v352_v12 = vsel %vm89_vm1, %v258_v32, 0.0  ;;  %v994_v31 = vld [vmem:[%s1203_s0 + $0x1a0] sm:$0xff]  ;;  %v266_v57 = vmul.f32 %v864_v3, %v864_v3 }
  0x54   :  { %v193_v28 = vsel %vm89_vm1, %v994_v31, 0.0 }
  0x55   :  { %v174_v46 = vadd.f32 %v173_v19, %v172_v39  ;;  %v349_v18 = vadd.f32 %v348_v62, %v347_v4  ;;  %v354_v19 = vsel %vm89_vm1, %v259_v35, 0.0  ;;  %v1004_v39 = vld [vmem:[%s1203_s0 + $0x1a8] sm:$0xff]  ;;  %v267_v62 = vmul.f32 %v874_v7, %v874_v7 }
  0x56   :  { %v195_v36 = vsel %vm89_vm1, %v1004_v39, 0.0 }
  0x57   :  { %v176_v54 = vadd.f32 %v175_v27, %v174_v46  ;;  %v351_v25 = vadd.f32 %v350_v1, %v349_v18  ;;  %v356_v27 = vsel %vm89_vm1, %v260_v38, 0.0  ;;  %v1014_v46 = vld [vmem:[%s1203_s0 + $0x1b0] sm:$0xff]  ;;  %v268_v1 = vmul.f32 %v884_v15, %v884_v15 }
  0x58   :  { %v197_v43 = vsel %vm89_vm1, %v1014_v46, 0.0 }
  0x59   :  { %v178_v60 = vadd.f32 %v177_v34, %v176_v54  ;;  %v353_v33 = vadd.f32 %v352_v12, %v351_v25  ;;  %v358_v34 = vsel %vm89_vm1, %v261_v41, 0.0  ;;  %v1024_v54 = vld [vmem:[%s1203_s0 + $0x1b8] sm:$0xff]  ;;  %v269_v12 = vmul.f32 %v894_v22, %v894_v22 }
  0x5a   :  { %v199_v51 = vsel %vm89_vm1, %v1024_v54, 0.0 }
  0x5b   :  { %v180_v5 = vadd.f32 %v179_v42, %v178_v60  ;;  %v355_v40 = vadd.f32 %v354_v19, %v353_v33  ;;  %v360_v42 = vsel %vm89_vm1, %v262_v44, 0.0  ;;  %v1034_v60 = vld [vmem:[%s1203_s0 + $0x1c0] sm:$0xff]  ;;  %v270_v19 = vmul.f32 %v904_v30, %v904_v30 }
  0x5c   :  { %v201_v58 = vsel %vm89_vm1, %v1034_v60, 0.0 }
  0x5d   :  { %v182_v10 = vadd.f32 %v181_v49, %v180_v5  ;;  %v357_v48 = vadd.f32 %v356_v27, %v355_v40  ;;  %v362_v49 = vsel %vm89_vm1, %v263_v47, 0.0  ;;  %v1044_v5 = vld [vmem:[%s1203_s0 + $0x1c8] sm:$0xff]  ;;  %v271_v27 = vmul.f32 %v914_v37, %v914_v37 }
  0x5e   :  { %v203_v3 = vsel %vm89_vm1, %v1044_v5, 0.0 }
  0x5f   :  { %v184_v8 = vadd.f32 %v183_v56, %v182_v10  ;;  %v359_v55 = vadd.f32 %v358_v34, %v357_v48  ;;  %v364_v56 = vsel %vm89_vm1, %v264_v50, 0.0  ;;  %v1054_v10 = vld [vmem:[%s1203_s0 + $0x1d0] sm:$0xff]  ;;  %v272_v34 = vmul.f32 %v924_v45, %v924_v45 }
  0x60   :  { %v205_v7 = vsel %vm89_vm1, %v1054_v10, 0.0  ;;  %v273_v50 = vmul.f32 %v934_v52, %v934_v52  ;;  %v274_v45 = vmul.f32 %v944_v59, %v944_v59  ;;  %v277_v59 = vmul.f32 %v974_v16, %v974_v16 }
  0x61   :  { %v186_v11 = vadd.f32 %v185_v63, %v184_v8  ;;  %v361_v61 = vadd.f32 %v360_v42, %v359_v55  ;;  %v366_v63 = vsel %vm89_vm1, %v265_v53, 0.0  ;;  %v1064_v8 = vld [vmem:[%s1203_s0 + $0x1d8] sm:$0xff]  ;;  %v378_v42 = vsel %vm89_vm1, %v271_v27, 0.0 }
  0x62   :  { %v207_v15 = vsel %vm89_vm1, %v1064_v8, 0.0  ;;  %v380_v53 = vsel %vm89_vm1, %v272_v34, 0.0  ;;  %v280_v16 = vmul.f32 %v1004_v39, %v1004_v39  ;;  %v283_v39 = vmul.f32 %v1034_v60, %v1034_v60 }
  0x63   :  { %v188_v14 = vadd.f32 %v187_v6, %v186_v11  ;;  %v363_v2 = vadd.f32 %v362_v49, %v361_v61  ;;  %v368_v6 = vsel %vm89_vm1, %v266_v57, 0.0  ;;  %v1074_v11 = vld [vmem:[%s1203_s0 + $0x1e0] sm:$0xff]  ;;  %v275_v61 = vmul.f32 %v954_v0, %v954_v0 }
  0x64   :  { %v209_v22 = vsel %vm89_vm1, %v1074_v11, 0.0  ;;  %v278_v0 = vmul.f32 %v984_v24, %v984_v24  ;;  %v281_v24 = vmul.f32 %v1014_v46, %v1014_v46  ;;  %v284_v46 = vmul.f32 %v1044_v5, %v1044_v5 }
  0x65   :  { %v190_v17 = vadd.f32 %v189_v13, %v188_v14  ;;  %v365_v4 = vadd.f32 %v364_v56, %v363_v2  ;;  %v370_v13 = vsel %vm89_vm1, %v267_v62, 0.0  ;;  %v1084_v14 = vld [vmem:[%s1203_s0 + $0x1e8] sm:$0xff]  ;;  %v276_v56 = vmul.f32 %v964_v9, %v964_v9 }
  0x66   :  { %v211_v30 = vsel %vm89_vm1, %v1084_v14, 0.0  ;;  %v386_v62 = vsel %vm89_vm1, %v275_v61, 0.0  ;;  %v279_v9 = vmul.f32 %v994_v31, %v994_v31  ;;  %v404_v60 = vsel %vm89_vm1, %v284_v46, 0.0 }
  0x67   :  { %v192_v20 = vadd.f32 %v191_v21, %v190_v17  ;;  %v367_v18 = vadd.f32 %v366_v63, %v365_v4  ;;  %v372_v21 = vsel %vm89_vm1, %v268_v1, 0.0  ;;  %v1094_v17 = vld [vmem:[%s1203_s0 + $0x1f0] sm:$0xff]  ;;  %v388_v4 = vsel %vm89_vm1, %v276_v56, 0.0  ;;  %v226_v56 = vld [vmem:[#allocation2 + $0x1] sm:$0x1] }
  0x68   :  { %v213_v37 = vsel %vm89_vm1, %v1094_v17, 0.0 }
  0x69   :  { %v194_v23 = vadd.f32 %v193_v28, %v192_v20  ;;  %v369_v25 = vadd.f32 %v368_v6, %v367_v18  ;;  %v374_v28 = vsel %vm89_vm1, %v269_v12, 0.0  ;;  %v1104_v20 = vld [vmem:[%s1203_s0 + $0x1f8] sm:$0xff]  ;;  %v390_v6 = vsel %vm89_vm1, %v277_v59, 0.0  ;;  %v88_v12 = vld [vmem:[#allocation2] sm:$0x1] }
  0x6b   :  { %v196_v26 = vadd.f32 %v195_v36, %v194_v23  ;;  %v371_v33 = vadd.f32 %v370_v13, %v369_v25  ;;  %v376_v36 = vsel %vm89_vm1, %v270_v19, 0.0  ;;  %v394_v25 = vsel %vm89_vm1, %v279_v9, 0.0 }
  0x6c   :  { %v282_v19 = vmul.f32 %v1024_v54, %v1024_v54  ;;  %v285_v54 = vmul.f32 %v1054_v10, %v1054_v10 }
  0x6d   :  { %v198_v29 = vadd.f32 %v197_v43, %v196_v26  ;;  %v373_v40 = vadd.f32 %v372_v21, %v371_v33  ;;  %v215_v43 = vsel %vm89_vm1, %v1104_v20, 0.0  ;;  %v396_v21 = vsel %vm89_vm1, %v280_v16, 0.0 }
  0x6e   :  { %v398_v33 = vsel %vm89_vm1, %v281_v24, 0.0  ;;  %v400_v27 = vsel %vm89_vm1, %v282_v19, 0.0  ;;  %v406_v5 = vsel %vm89_vm1, %v285_v54, 0.0 }
  0x6f   :  { %v200_v32 = vadd.f32 %v199_v51, %v198_v29  ;;  %v375_v48 = vadd.f32 %v374_v28, %v373_v40  ;;  %v382_v29 = vsel %vm89_vm1, %v273_v50, 0.0  ;;  %v289_v50 = vmul.f32 %v1094_v17, %v1094_v17 }
  0x71   :  { %v202_v35 = vadd.f32 %v201_v58, %v200_v32  ;;  %v377_v55 = vadd.f32 %v376_v36, %v375_v48  ;;  %v384_v58 = vsel %vm89_vm1, %v274_v45, 0.0  ;;  %v287_v36 = vmul.f32 %v1074_v11, %v1074_v11 }
  0x72   :  { %v288_v48 = vmul.f32 %v1084_v14, %v1084_v14 }
  0x73   :  { %v204_v38 = vadd.f32 %v203_v3, %v202_v35  ;;  %v379_v49 = vadd.f32 %v378_v42, %v377_v55 }
  0x74   :  { %v412_v11 = vsel %vm89_vm1, %v288_v48, 0.0 }
  0x75   :  { %v206_v41 = vadd.f32 %v205_v7, %v204_v38  ;;  %v381_v52 = vadd.f32 %v380_v53, %v379_v49  ;;  %v392_v38 = vsel %vm89_vm1, %v278_v0, 0.0  ;;  %v438_v0 = vld [vmem:[%s1204_s1] sm:$0x1] }
  0x77   :  { %v208_v44 = vadd.f32 %v207_v15, %v206_v41  ;;  %v383_v2 = vadd.f32 %v382_v29, %v381_v52 }
  0x79   :  { %v210_v47 = vadd.f32 %v209_v22, %v208_v44  ;;  %v385_v63 = vadd.f32 %v384_v58, %v383_v2 }
  0x7b   :  { %v212_v23 = vadd.f32 %v211_v30, %v210_v47  ;;  %v387_v35 = vadd.f32 %v386_v62, %v385_v63  ;;  %v402_v30 = vsel %vm89_vm1, %v283_v39, 0.0  ;;  %v286_v47 = vmul.f32 %v1064_v8, %v1064_v8 }
  0x7c   :  { %v410_v8 = vsel %vm89_vm1, %v287_v36, 0.0 }
  0x7d   :  { %v214_v26 = vadd.f32 %v213_v37, %v212_v23  ;;  %v389_v7 = vadd.f32 %v388_v4, %v387_v35  ;;  %v408_v10 = vsel %vm89_vm1, %v286_v47, 0.0 }
  0x7f   :  { %v216_v51 = vadd.f32 %v215_v43, %v214_v26  ;;  %v391_v13 = vadd.f32 %v390_v6, %v389_v7  ;;  %v290_v43 = vmul.f32 %v1104_v20, %v1104_v20  ;;  %v414_v26 = vsel %vm89_vm1, %v289_v50, 0.0 }
  0x81   :  { %v217_v57 = vrot.slane %v216_v51, 4  ;;  %v393_v41 = vadd.f32 %v392_v38, %v391_v13  ;;  %v416_v14 = vsel %vm89_vm1, %v290_v43, 0.0 }
  0x83   :  { %v218_v32 = vadd.f32 %v217_v57, %v216_v51  ;;  %v395_v22 = vadd.f32 %v394_v25, %v393_v41 }
  0x85   :  { %v219_v3 = vrot.slane %v218_v32, 2  ;;  %v397_v44 = vadd.f32 %v396_v21, %v395_v22 }
  0x87   :  { %v220_v1 = vadd.f32 %v219_v3, %v218_v32  ;;  %v399_v28 = vadd.f32 %v398_v33, %v397_v44 }
  0x89   :  { %v221_v18 = vrot.slane %v220_v1, 1  ;;  %v401_v40 = vadd.f32 %v400_v27, %v399_v28 }
  0x8b   :  { %v222_v15 = vadd.f32 %v221_v18, %v220_v1  ;;  %v403_v34 = vadd.f32 %v402_v30, %v401_v40  ;;  %v441_v1 = vld [vmem:[%s1205_s2] sm:$0x1] }
  0x8d   :  { %v223_v31 = vadd.f32 %v222_v15, %v88_v12  ;;  %v405_v37 = vadd.f32 %v404_v60, %v403_v34 }
  0x8f   :  { %225 = vst.msk [vmem:[#allocation2] sm:$0x1] %vm224_vm2, %v223_v31  ;;  %v407_v23 = vadd.f32 %v406_v5, %v405_v37 }
  0x91   :  { %v409_v42 = vadd.f32 %v408_v10, %v407_v23 }
  0x93   :  { %v411_v55 = vadd.f32 %v410_v8, %v409_v42 }
  0x95   :  { %v413_v45 = vadd.f32 %v412_v11, %v411_v55 }
  0x96   :  { %v429_v2 = vld [vmem:[#allocation2] sm:$0x1] }
  0x97   :  { %v415_v53 = vadd.f32 %v414_v26, %v413_v45  ;;  %v431_v20 = vmul.f32 0.001953125, %v429_v2 }
  0x99   :  { %v417_v49 = vadd.f32 %v416_v14, %v415_v53  ;;  %v434_v32 = vmul.f32 %v431_v20, %v431_v20 }
  0x9b   :  { %v418_v51 = vrot.slane %v417_v49, 4 }
  0x9d   :  { %v419_v61 = vadd.f32 %v418_v51, %v417_v49 }
  0x9f   :  { %v420_v29 = vrot.slane %v419_v61, 2 }
  0xa1   :  { %v421_v17 = vadd.f32 %v420_v29, %v419_v61 }
  0xa3   :  { %v422_v52 = vrot.slane %v421_v17, 1 }
  0xa5   :  { %v423_v57 = vadd.f32 %v422_v52, %v421_v17 }
  0xa7   :  { %v424_v58 = vadd.f32 %v423_v57, %v226_v56 }
  0xa9   :  { %425 = vst.msk [vmem:[#allocation2 + $0x1] sm:$0x1] %vm224_vm2, %v424_v58 }
  0xb0   :  { %v432_v59 = vld [vmem:[#allocation2 + $0x1] sm:$0x1] }
  0xb1   :  { %v433_v62 = vmul.f32 0.001953125, %v432_v59 }
  0xb3   :  { %v435_v63 = vsub.f32 %v433_v62, %v434_v32 }
  0xb5   :  { %v436_v3 = vadd.f32 1e-05, %v435_v63 }
  0xb7   :  { %476 = vrsqrt.f32 %v436_v3 }
  0xc1   :  { %v477_v4 = vpop.eup %476 }
  0xc2   :  { %v439_v35 = vmul.f32 %v477_v4, %v438_v0 }
  0xc4   :  { %440 = vst.msk [vmem:[#allocation3] sm:$0x1] %vm224_vm2, %v439_v35  ;;  %v442_v9 = vmul.f32 %v439_v35, %v431_v20 }
  0xc5   :  { %489 = shalt.err (!%p486_p4)
}
  0xc6   :  { %s490_s23 = scalar_lea.hbm %s1206_s3, 16 }
  0xc7   :  { %p491_p5 = scmp.ne.s32.totalorder %s1206_s3, %s490_s23  ;;  %p494_p6 = scmp.lt.u32.totalorder %s490_s23, %s1206_s3 }
  0xc9   :  { %p496_p7 = pnand %p494_p6, %p491_p5 }
  0xcb   :  { %499 = shalt.err (!%p496_p7)
}
  0xcc   :  { %454 = dma.vmem_to_hbm [thread:$0]  %s452_s15, 16, %s1206_s3, [#allocation4]   ;;  %v443_v6 = vsub.f32 %v441_v1, %v442_v9 }
  0xcd   :  { %s500_s29 = scalar_lea.vmem %s462_s19, 16  ;;  %s504_s30 = scalar_lea.vmem %s462_s19, 32 }
  0xce   :  { %444 = vst.msk [vmem:[#allocation5] sm:$0x1] %vm224_vm2, %v443_v6  ;;  %p501_p8 = scmp.ne.s32.totalorder %s462_s19, %s500_s29  ;;  %p505_p9 = scmp.lt.s32.totalorder %s462_s19, %s462_s19 }
  0xcf   :  { %p506_p10 = scmp.lt.s32.totalorder %s504_s30, %s500_s29 }
  0xd1   :  { %p507_p11 = por %p506_p10, %p505_p9 }
  0xd3   :  { %p508_p12 = pnand %p507_p11, %p501_p8 }
  0xd5   :  { %511 = shalt.err (!%p508_p12)
}
  0xd6   :  { %s512_s7 = scalar_lea.hbm %s1207_s4, 16 }
  0xd7   :  { %p513_p13 = scmp.ne.s32.totalorder %s1207_s4, %s512_s7  ;;  %p516_p0 = scmp.lt.u32.totalorder %s512_s7, %s1207_s4 }
  0xd9   :  { %p518_p1 = pnand %p516_p0, %p513_p13 }
  0xdb   :  { %521 = shalt.err (!%p518_p1)
}
  0xdc   :  { %464 = dma.vmem_to_hbm [thread:$0]  %s462_s19, 16, %s1207_s4, [#allocation6]  }
  0xdd   :  { %522 = dma.done.wait [#allocation4], 16  }
  0xde   :  { %523 = vsyncadd [#allocation4], 4294967280 }
  0xdf   :  { %524 = dma.done.wait [#allocation6], 16  }
  0xe0   :  { %525 = vsyncadd [#allocation6], 4294967280 }
  0xe1   :  { %471 = vsyncpa [#allocation4], 1 }
  0xe2   :  { %472 = vsyncpa [#allocation6], 1 }

// kernel: tpu_custom_call.1
= control target key start
LH: loop header
LB: loop body
LE: loop exit
PB: predicated region body
PF: predicated region fallthrough
CT: control target
= control target key end

     0   :  { %10 = vsyncpa [#allocation4], 0  ;;  %vm86_vm0 = vcmask 25600   ;;  %vm89_vm1 = vcmask 31744   ;;  %v526_v3 = vmov 0.0   ;;  %s1203_s0 = inlined_call_operand.vmem [shape: f32[2,256,4], index: 0, kind: input, shape index: {}]   ;;  %s1204_s1 = inlined_call_operand.vmem [shape: f32[1,4], index: 1, kind: input, shape index: {}]   ;;  %s1205_s2 = inlined_call_operand.vmem [shape: f32[1,4], index: 2, kind: input, shape index: {}]   ;;  %s1206_s3 = inlined_call_operand.hbm [shape: f32[1,4], index: 3, kind: output, shape index: {0}]   ;;  %s1207_s4 = inlined_call_operand.hbm [shape: f32[1,4], index: 4, kind: output, shape index: {1}]  }
   0x1   :  { %v18_v0 = vld [vmem:[%s1203_s0] sm:$0xff]  ;;  %v19_v1 = vld [vmem:[%s1203_s0 + $0x8] sm:$0xff]  ;;  %v20_v2 = vld [vmem:[%s1203_s0 + $0x10] sm:$0xff]  ;;  %87 = vst.msk [vmem:[#allocation2] sm:$0x3] %vm86_vm0, %v526_v3 }
   0x2   :  { %v21_v4 = vld [vmem:[%s1203_s0 + $0x18] sm:$0xff]  ;;  %v90_v5 = vsel %vm89_vm1, %v18_v0, 0.0  ;;  %v91_v6 = vsel %vm89_vm1, %v19_v1, 0.0  ;;  %v93_v7 = vsel %vm89_vm1, %v20_v2, 0.0  ;;  %v22_v8 = vld [vmem:[%s1203_s0 + $0x20] sm:$0xff]  ;;  %v576_v11 = vld [vmem:[%s1203_s0 + $0x28] sm:$0xff] }
   0x3   :  { %v92_v9 = vadd.f32 %v91_v6, %v90_v5  ;;  %v95_v10 = vsel %vm89_vm1, %v21_v4, 0.0  ;;  %v97_v13 = vsel %vm89_vm1, %v22_v8, 0.0  ;;  %v582_v14 = vld [vmem:[%s1203_s0 + $0x30] sm:$0xff]  ;;  %v99_v16 = vsel %vm89_vm1, %v576_v11, 0.0  ;;  %v589_v17 = vld [vmem:[%s1203_s0 + $0x38] sm:$0xff]  ;;  %v596_v20 = vld [vmem:[%s1203_s0 + $0x40] sm:$0xff] }
   0x4   :  { %v101_v19 = vsel %vm89_vm1, %v582_v14, 0.0  ;;  %v103_v22 = vsel %vm89_vm1, %v589_v17, 0.0  ;;  %v603_v23 = vld [vmem:[%s1203_s0 + $0x48] sm:$0xff]  ;;  %v105_v25 = vsel %vm89_vm1, %v596_v20, 0.0  ;;  %v610_v26 = vld [vmem:[%s1203_s0 + $0x50] sm:$0xff]  ;;  %v617_v29 = vld [vmem:[%s1203_s0 + $0x58] sm:$0xff] }
   0x5   :  { %v94_v12 = vadd.f32 %v93_v7, %v92_v9  ;;  %v107_v28 = vsel %vm89_vm1, %v603_v23, 0.0  ;;  %v109_v31 = vsel %vm89_vm1, %v610_v26, 0.0  ;;  %v624_v32 = vld [vmem:[%s1203_s0 + $0x60] sm:$0xff]  ;;  %v111_v34 = vsel %vm89_vm1, %v617_v29, 0.0  ;;  %v631_v35 = vld [vmem:[%s1203_s0 + $0x68] sm:$0xff]  ;;  %v638_v38 = vld [vmem:[%s1203_s0 + $0x70] sm:$0xff] }
   0x6   :  { %v113_v37 = vsel %vm89_vm1, %v624_v32, 0.0 }
   0x7   :  { %v96_v15 = vadd.f32 %v95_v10, %v94_v12 }
   0x9   :  { %v98_v18 = vadd.f32 %v97_v13, %v96_v15 }
   0xb   :  { %v100_v21 = vadd.f32 %v99_v16, %v98_v18 }
   0xd   :  { %v102_v24 = vadd.f32 %v101_v19, %v100_v21 }
   0xf   :  { %v104_v27 = vadd.f32 %v103_v22, %v102_v24 }
  0x11   :  { %v106_v30 = vadd.f32 %v105_v25, %v104_v27 }
  0x13   :  { %v108_v33 = vadd.f32 %v107_v28, %v106_v30 }
  0x15   :  { %v110_v36 = vadd.f32 %v109_v31, %v108_v33 }
  0x17   :  { %v112_v39 = vadd.f32 %v111_v34, %v110_v36 }
  0x18   :  { %11 = vsyncpa [#allocation6], 0  ;;  %v115_v40 = vsel %vm89_vm1, %v631_v35, 0.0  ;;  %v645_v41 = vld [vmem:[%s1203_s0 + $0x78] sm:$0xff]  ;;  %v117_v43 = vsel %vm89_vm1, %v638_v38, 0.0  ;;  %v652_v44 = vld [vmem:[%s1203_s0 + $0x80] sm:$0xff]  ;;  %v227_v56 = vmul.f32 %v18_v0, %v18_v0  ;;  %v228_v59 = vmul.f32 %v19_v1, %v19_v1 }
  0x19   :  { %v114_v42 = vadd.f32 %v113_v37, %v112_v39  ;;  %v119_v46 = vsel %vm89_vm1, %v645_v41, 0.0  ;;  %v659_v47 = vld [vmem:[%s1203_s0 + $0x88] sm:$0xff]  ;;  %v121_v49 = vsel %vm89_vm1, %v652_v44, 0.0  ;;  %v666_v50 = vld [vmem:[%s1203_s0 + $0x90] sm:$0xff]  ;;  %v673_v53 = vld [vmem:[%s1203_s0 + $0x98] sm:$0xff]  ;;  %v229_v60 = vmul.f32 %v20_v2, %v20_v2  ;;  %s527_s14 = smov [#allocation3]  }
  0x1a   :  { %v123_v52 = vsel %vm89_vm1, %v659_v47, 0.0  ;;  %v125_v55 = vsel %vm89_vm1, %v666_v50, 0.0  ;;  %v680_v57 = vld [vmem:[%s1203_s0 + $0xa0] sm:$0xff]  ;;  %v127_v61 = vsel %vm89_vm1, %v673_v53, 0.0  ;;  %v687_v62 = vld [vmem:[%s1203_s0 + $0xa8] sm:$0xff]  ;;  %v230_v3 = vmul.f32 %v21_v4, %v21_v4  ;;  %v695_v1 = vld [vmem:[%s1203_s0 + $0xb0] sm:$0xff] }
  0x1b   :  { %v116_v45 = vadd.f32 %v115_v40, %v114_v42  ;;  %v129_v0 = vsel %vm89_vm1, %v680_v57, 0.0  ;;  %v291_v5 = vsel %vm89_vm1, %v227_v56, 0.0  ;;  %v231_v6 = vmul.f32 %v22_v8, %v22_v8  ;;  %v704_v12 = vld [vmem:[%s1203_s0 + $0xb8] sm:$0xff]  ;;  %v714_v19 = vld [vmem:[%s1203_s0 + $0xc0] sm:$0xff]  ;;  %v724_v27 = vld [vmem:[%s1203_s0 + $0xc8] sm:$0xff]  ;;  %s451_s15 = sshll.u32 %s527_s14, 4  ;;  %s452_s15 = int_to_ptr.vmem [resolvable:$true] %s451_s15 }
  0x1c   :  { %v292_v7 = vsel %vm89_vm1, %v228_v59, 0.0  ;;  %v294_v9 = vsel %vm89_vm1, %v229_v60, 0.0  ;;  %v131_v10 = vsel %vm89_vm1, %v687_v62, 0.0  ;;  %v232_v15 = vmul.f32 %v576_v11, %v576_v11  ;;  %v734_v34 = vld [vmem:[%s1203_s0 + $0xd0] sm:$0xff]  ;;  %v744_v42 = vld [vmem:[%s1203_s0 + $0xd8] sm:$0xff]  ;;  %v764_v56 = vld [vmem:[%s1203_s0 + $0xe8] sm:$0xff]  ;;  %p483_p1 = scmp.lt.s32.totalorder %s452_s15, %s452_s15 }
  0x1d   :  { %v118_v48 = vadd.f32 %v117_v43, %v116_v45  ;;  %v293_v4 = vadd.f32 %v292_v7, %v291_v5  ;;  %v296_v16 = vsel %vm89_vm1, %v230_v3, 0.0  ;;  %v133_v8 = vsel %vm89_vm1, %v695_v1, 0.0  ;;  %s528_s18 = smov [#allocation5]   ;;  %s478_s20 = scalar_lea.vmem %s452_s15, 16 }
  0x1e   :  { %v233_v22 = vmul.f32 %v582_v14, %v582_v14  ;;  %v298_v24 = vsel %vm89_vm1, %v231_v6, 0.0  ;;  %v135_v11 = vsel %vm89_vm1, %v704_v12, 0.0  ;;  %v234_v30 = vmul.f32 %v589_v17, %v589_v17  ;;  %v784_v6 = vld [vmem:[%s1203_s0 + $0xf8] sm:$0xff]  ;;  %s461_s19 = sshll.u32 %s528_s18, 4  ;;  %p479_p0 = scmp.ne.s32.totalorder %s452_s15, %s478_s20  ;;  %s462_s19 = int_to_ptr.vmem [resolvable:$true] %s461_s19 }
  0x1f   :  { %v120_v51 = vadd.f32 %v119_v46, %v118_v48  ;;  %v295_v18 = vadd.f32 %v294_v9, %v293_v4  ;;  %v300_v31 = vsel %vm89_vm1, %v232_v15, 0.0  ;;  %v137_v14 = vsel %vm89_vm1, %v714_v19, 0.0  ;;  %s482_s21 = scalar_lea.vmem %s452_s15, 32 }
  0x20   :  { %v235_v37 = vmul.f32 %v596_v20, %v596_v20  ;;  %v302_v39 = vsel %vm89_vm1, %v233_v22, 0.0  ;;  %v139_v17 = vsel %vm89_vm1, %v724_v27, 0.0  ;;  %v236_v45 = vmul.f32 %v603_v23, %v603_v23  ;;  %p484_p2 = scmp.lt.s32.totalorder %s482_s21, %s478_s20 }
  0x21   :  { %v122_v54 = vadd.f32 %v121_v49, %v120_v51  ;;  %v297_v25 = vadd.f32 %v296_v16, %v295_v18  ;;  %v304_v46 = vsel %vm89_vm1, %v234_v30, 0.0  ;;  %v141_v20 = vsel %vm89_vm1, %v734_v34, 0.0  ;;  %v754_v49 = vld [vmem:[%s1203_s0 + $0xe0] sm:$0xff] }
  0x22   :  { %v143_v23 = vsel %vm89_vm1, %v744_v42, 0.0  ;;  %v238_v59 = vmul.f32 %v617_v29, %v617_v29  ;;  %v308_v60 = vsel %vm89_vm1, %v236_v45, 0.0  ;;  %v147_v29 = vsel %vm89_vm1, %v764_v56, 0.0  ;;  %p485_p3 = por %p484_p2, %p483_p1 }
  0x23   :  { %v124_v58 = vadd.f32 %v123_v52, %v122_v54  ;;  %v299_v33 = vadd.f32 %v298_v24, %v297_v25  ;;  %v237_v52 = vmul.f32 %v610_v26, %v610_v26  ;;  %v306_v54 = vsel %vm89_vm1, %v235_v37, 0.0 }
  0x24   :  { %v145_v26 = vsel %vm89_vm1, %v754_v49, 0.0  ;;  %v240_v9 = vmul.f32 %v631_v35, %v631_v35  ;;  %v241_v16 = vmul.f32 %v638_v38, %v638_v38  ;;  %v151_v35 = vsel %vm89_vm1, %v784_v6, 0.0  ;;  %p486_p4 = pnand %p485_p3, %p479_p0 }
  0x25   :  { %v126_v63 = vadd.f32 %v125_v55, %v124_v58  ;;  %v301_v40 = vadd.f32 %v300_v31, %v299_v33  ;;  %v310_v5 = vsel %vm89_vm1, %v237_v52, 0.0  ;;  %v242_v24 = vmul.f32 %v645_v41, %v645_v41 }
  0x26   :  { %v243_v31 = vmul.f32 %v652_v44, %v652_v44  ;;  %vm224_vm2 = vcmask 24576  }
  0x27   :  { %v128_v2 = vadd.f32 %v127_v61, %v126_v63  ;;  %v303_v48 = vadd.f32 %v302_v39, %v301_v40  ;;  %v774_v63 = vld [vmem:[%s1203_s0 + $0xf0] sm:$0xff]  ;;  %v244_v39 = vmul.f32 %v659_v47, %v659_v47 }
  0x29   :  { %v130_v13 = vadd.f32 %v129_v0, %v128_v2  ;;  %v305_v55 = vadd.f32 %v304_v46, %v303_v48  ;;  %v239_v0 = vmul.f32 %v624_v32, %v624_v32  ;;  %v149_v32 = vsel %vm89_vm1, %v774_v63, 0.0 }
  0x2a   :  { %v245_v46 = vmul.f32 %v666_v50, %v666_v50 }
  0x2b   :  { %v132_v21 = vadd.f32 %v131_v10, %v130_v13  ;;  %v307_v61 = vadd.f32 %v306_v54, %v305_v55  ;;  %v312_v10 = vsel %vm89_vm1, %v238_v59, 0.0  ;;  %v794_v13 = vld [vmem:[%s1203_s0 + $0x100] sm:$0xff]  ;;  %v246_v54 = vmul.f32 %v673_v53, %v673_v53 }
  0x2c   :  { %v153_v38 = vsel %vm89_vm1, %v794_v13, 0.0 }
  0x2d   :  { %v134_v28 = vadd.f32 %v133_v8, %v132_v21  ;;  %v309_v2 = vadd.f32 %v308_v60, %v307_v61  ;;  %v314_v8 = vsel %vm89_vm1, %v239_v0, 0.0  ;;  %v804_v21 = vld [vmem:[%s1203_s0 + $0x108] sm:$0xff]  ;;  %v247_v60 = vmul.f32 %v680_v57, %v680_v57 }
  0x2e   :  { %v155_v41 = vsel %vm89_vm1, %v804_v21, 0.0 }
  0x2f   :  { %v136_v36 = vadd.f32 %v135_v11, %v134_v28  ;;  %v311_v4 = vadd.f32 %v310_v5, %v309_v2  ;;  %v316_v11 = vsel %vm89_vm1, %v240_v9, 0.0  ;;  %v814_v28 = vld [vmem:[%s1203_s0 + $0x110] sm:$0xff]  ;;  %v248_v5 = vmul.f32 %v687_v62, %v687_v62 }
  0x30   :  { %v157_v44 = vsel %vm89_vm1, %v814_v28, 0.0 }
  0x31   :  { %v138_v43 = vadd.f32 %v137_v14, %v136_v36  ;;  %v313_v18 = vadd.f32 %v312_v10, %v311_v4  ;;  %v318_v14 = vsel %vm89_vm1, %v241_v16, 0.0  ;;  %v824_v36 = vld [vmem:[%s1203_s0 + $0x118] sm:$0xff]  ;;  %v249_v10 = vmul.f32 %v695_v1, %v695_v1 }
  0x32   :  { %v159_v47 = vsel %vm89_vm1, %v824_v36, 0.0 }
  0x33   :  { %v140_v51 = vadd.f32 %v139_v17, %v138_v43  ;;  %v315_v25 = vadd.f32 %v314_v8, %v313_v18  ;;  %v320_v17 = vsel %vm89_vm1, %v242_v24, 0.0  ;;  %v834_v43 = vld [vmem:[%s1203_s0 + $0x120] sm:$0xff]  ;;  %v250_v8 = vmul.f32 %v704_v12, %v704_v12 }
  0x34   :  { %v161_v50 = vsel %vm89_vm1, %v834_v43, 0.0 }
  0x35   :  { %v142_v58 = vadd.f32 %v141_v20, %v140_v51  ;;  %v317_v33 = vadd.f32 %v316_v11, %v315_v25  ;;  %v322_v20 = vsel %vm89_vm1, %v243_v31, 0.0  ;;  %v844_v51 = vld [vmem:[%s1203_s0 + $0x128] sm:$0xff]  ;;  %v251_v11 = vmul.f32 %v714_v19, %v714_v19 }
  0x36   :  { %v163_v53 = vsel %vm89_vm1, %v844_v51, 0.0 }
  0x37   :  { %v144_v3 = vadd.f32 %v143_v23, %v142_v58  ;;  %v319_v40 = vadd.f32 %v318_v14, %v317_v33  ;;  %v324_v23 = vsel %vm89_vm1, %v244_v39, 0.0  ;;  %v854_v58 = vld [vmem:[%s1203_s0 + $0x130] sm:$0xff]  ;;  %v252_v14 = vmul.f32 %v724_v27, %v724_v27 }
  0x38   :  { %v165_v57 = vsel %vm89_vm1, %v854_v58, 0.0 }
  0x39   :  { %v146_v7 = vadd.f32 %v145_v26, %v144_v3  ;;  %v321_v48 = vadd.f32 %v320_v17, %v319_v40  ;;  %v326_v26 = vsel %vm89_vm1, %v245_v46, 0.0  ;;  %v864_v3 = vld [vmem:[%s1203_s0 + $0x138] sm:$0xff]  ;;  %v253_v17 = vmul.f32 %v734_v34, %v734_v34 }
  0x3a   :  { %v167_v62 = vsel %vm89_vm1, %v864_v3, 0.0 }
  0x3b   :  { %v148_v15 = vadd.f32 %v147_v29, %v146_v7  ;;  %v323_v55 = vadd.f32 %v322_v20, %v321_v48  ;;  %v328_v29 = vsel %vm89_vm1, %v246_v54, 0.0  ;;  %v874_v7 = vld [vmem:[%s1203_s0 + $0x140] sm:$0xff]  ;;  %v254_v20 = vmul.f32 %v744_v42, %v744_v42 }
  0x3c   :  { %v169_v1 = vsel %vm89_vm1, %v874_v7, 0.0 }
  0x3d   :  { %v150_v22 = vadd.f32 %v149_v32, %v148_v15  ;;  %v325_v61 = vadd.f32 %v324_v23, %v323_v55  ;;  %v330_v32 = vsel %vm89_vm1, %v247_v60, 0.0  ;;  %v884_v15 = vld [vmem:[%s1203_s0 + $0x148] sm:$0xff]  ;;  %v255_v23 = vmul.f32 %v754_v49, %v754_v49 }
  0x3e   :  { %v171_v12 = vsel %vm89_vm1, %v884_v15, 0.0 }
  0x3f   :  { %v152_v30 = vadd.f32 %v151_v35, %v150_v22  ;;  %v327_v2 = vadd.f32 %v326_v26, %v325_v61  ;;  %v332_v35 = vsel %vm89_vm1, %v248_v5, 0.0  ;;  %v894_v22 = vld [vmem:[%s1203_s0 + $0x150] sm:$0xff]  ;;  %v256_v26 = vmul.f32 %v764_v56, %v764_v56 }
  0x40   :  { %v173_v19 = vsel %vm89_vm1, %v894_v22, 0.0 }
  0x41   :  { %v154_v37 = vadd.f32 %v153_v38, %v152_v30  ;;  %v329_v4 = vadd.f32 %v328_v29, %v327_v2  ;;  %v334_v38 = vsel %vm89_vm1, %v249_v10, 0.0  ;;  %v904_v30 = vld [vmem:[%s1203_s0 + $0x158] sm:$0xff]  ;;  %v257_v29 = vmul.f32 %v774_v63, %v774_v63 }
  0x42   :  { %v175_v27 = vsel %vm89_vm1, %v904_v30, 0.0 }
  0x43   :  { %v156_v45 = vadd.f32 %v155_v41, %v154_v37  ;;  %v331_v18 = vadd.f32 %v330_v32, %v329_v4  ;;  %v336_v41 = vsel %vm89_vm1, %v250_v8, 0.0  ;;  %v914_v37 = vld [vmem:[%s1203_s0 + $0x160] sm:$0xff]  ;;  %v258_v32 = vmul.f32 %v784_v6, %v784_v6 }
  0x44   :  { %v177_v34 = vsel %vm89_vm1, %v914_v37, 0.0 }
  0x45   :  { %v158_v52 = vadd.f32 %v157_v44, %v156_v45  ;;  %v333_v25 = vadd.f32 %v332_v35, %v331_v18  ;;  %v338_v44 = vsel %vm89_vm1, %v251_v11, 0.0  ;;  %v924_v45 = vld [vmem:[%s1203_s0 + $0x168] sm:$0xff]  ;;  %v259_v35 = vmul.f32 %v794_v13, %v794_v13 }
  0x46   :  { %v179_v42 = vsel %vm89_vm1, %v924_v45, 0.0 }
  0x47   :  { %v160_v59 = vadd.f32 %v159_v47, %v158_v52  ;;  %v335_v33 = vadd.f32 %v334_v38, %v333_v25  ;;  %v340_v47 = vsel %vm89_vm1, %v252_v14, 0.0  ;;  %v934_v52 = vld [vmem:[%s1203_s0 + $0x170] sm:$0xff]  ;;  %v260_v38 = vmul.f32 %v804_v21, %v804_v21 }
  0x48   :  { %v181_v49 = vsel %vm89_vm1, %v934_v52, 0.0 }
  0x49   :  { %v162_v0 = vadd.f32 %v161_v50, %v160_v59  ;;  %v337_v40 = vadd.f32 %v336_v41, %v335_v33  ;;  %v342_v50 = vsel %vm89_vm1, %v253_v17, 0.0  ;;  %v944_v59 = vld [vmem:[%s1203_s0 + $0x178] sm:$0xff]  ;;  %v261_v41 = vmul.f32 %v814_v28, %v814_v28 }
  0x4a   :  { %v183_v56 = vsel %vm89_vm1, %v944_v59, 0.0 }
  0x4b   :  { %v164_v9 = vadd.f32 %v163_v53, %v162_v0  ;;  %v339_v48 = vadd.f32 %v338_v44, %v337_v40  ;;  %v344_v53 = vsel %vm89_vm1, %v254_v20, 0.0  ;;  %v954_v0 = vld [vmem:[%s1203_s0 + $0x180] sm:$0xff]  ;;  %v262_v44 = vmul.f32 %v824_v36, %v824_v36 }
  0x4c   :  { %v185_v63 = vsel %vm89_vm1, %v954_v0, 0.0 }
  0x4d   :  { %v166_v16 = vadd.f32 %v165_v57, %v164_v9  ;;  %v341_v55 = vadd.f32 %v340_v47, %v339_v48  ;;  %v346_v57 = vsel %vm89_vm1, %v255_v23, 0.0  ;;  %v964_v9 = vld [vmem:[%s1203_s0 + $0x188] sm:$0xff]  ;;  %v263_v47 = vmul.f32 %v834_v43, %v834_v43 }
  0x4e   :  { %v187_v6 = vsel %vm89_vm1, %v964_v9, 0.0 }
  0x4f   :  { %v168_v24 = vadd.f32 %v167_v62, %v166_v16  ;;  %v343_v61 = vadd.f32 %v342_v50, %v341_v55  ;;  %v348_v62 = vsel %vm89_vm1, %v256_v26, 0.0  ;;  %v974_v16 = vld [vmem:[%s1203_s0 + $0x190] sm:$0xff]  ;;  %v264_v50 = vmul.f32 %v844_v51, %v844_v51 }
  0x50   :  { %v189_v13 = vsel %vm89_vm1, %v974_v16, 0.0 }
  0x51   :  { %v170_v31 = vadd.f32 %v169_v1, %v168_v24  ;;  %v345_v2 = vadd.f32 %v344_v53, %v343_v61  ;;  %v350_v1 = vsel %vm89_vm1, %v257_v29, 0.0  ;;  %v984_v24 = vld [vmem:[%s1203_s0 + $0x198] sm:$0xff]  ;;  %v265_v53 = vmul.f32 %v854_v58, %v854_v58 }
  0x52   :  { %v191_v21 = vsel %vm89_vm1, %v984_v24, 0.0 }
  0x53   :  { %v172_v39 = vadd.f32 %v171_v12, %v170_v31  ;;  %v347_v4 = vadd.f32 %v346_v57, %v345_v2  ;;  %v352_v12 = vsel %vm89_vm1, %v258_v32, 0.0  ;;  %v994_v31 = vld [vmem:[%s1203_s0 + $0x1a0] sm:$0xff]  ;;  %v266_v57 = vmul.f32 %v864_v3, %v864_v3 }
  0x54   :  { %v193_v28 = vsel %vm89_vm1, %v994_v31, 0.0 }
  0x55   :  { %v174_v46 = vadd.f32 %v173_v19, %v172_v39  ;;  %v349_v18 = vadd.f32 %v348_v62, %v347_v4  ;;  %v354_v19 = vsel %vm89_vm1, %v259_v35, 0.0  ;;  %v1004_v39 = vld [vmem:[%s1203_s0 + $0x1a8] sm:$0xff]  ;;  %v267_v62 = vmul.f32 %v874_v7, %v874_v7 }
  0x56   :  { %v195_v36 = vsel %vm89_vm1, %v1004_v39, 0.0 }
  0x57   :  { %v176_v54 = vadd.f32 %v175_v27, %v174_v46  ;;  %v351_v25 = vadd.f32 %v350_v1, %v349_v18  ;;  %v356_v27 = vsel %vm89_vm1, %v260_v38, 0.0  ;;  %v1014_v46 = vld [vmem:[%s1203_s0 + $0x1b0] sm:$0xff]  ;;  %v268_v1 = vmul.f32 %v884_v15, %v884_v15 }
  0x58   :  { %v197_v43 = vsel %vm89_vm1, %v1014_v46, 0.0 }
  0x59   :  { %v178_v60 = vadd.f32 %v177_v34, %v176_v54  ;;  %v353_v33 = vadd.f32 %v352_v12, %v351_v25  ;;  %v358_v34 = vsel %vm89_vm1, %v261_v41, 0.0  ;;  %v1024_v54 = vld [vmem:[%s1203_s0 + $0x1b8] sm:$0xff]  ;;  %v269_v12 = vmul.f32 %v894_v22, %v894_v22 }
  0x5a   :  { %v199_v51 = vsel %vm89_vm1, %v1024_v54, 0.0 }
  0x5b   :  { %v180_v5 = vadd.f32 %v179_v42, %v178_v60  ;;  %v355_v40 = vadd.f32 %v354_v19, %v353_v33  ;;  %v360_v42 = vsel %vm89_vm1, %v262_v44, 0.0  ;;  %v1034_v60 = vld [vmem:[%s1203_s0 + $0x1c0] sm:$0xff]  ;;  %v270_v19 = vmul.f32 %v904_v30, %v904_v30 }
  0x5c   :  { %v201_v58 = vsel %vm89_vm1, %v1034_v60, 0.0 }
  0x5d   :  { %v182_v10 = vadd.f32 %v181_v49, %v180_v5  ;;  %v357_v48 = vadd.f32 %v356_v27, %v355_v40  ;;  %v362_v49 = vsel %vm89_vm1, %v263_v47, 0.0  ;;  %v1044_v5 = vld [vmem:[%s1203_s0 + $0x1c8] sm:$0xff]  ;;  %v271_v27 = vmul.f32 %v914_v37, %v914_v37 }
  0x5e   :  { %v203_v3 = vsel %vm89_vm1, %v1044_v5, 0.0 }
  0x5f   :  { %v184_v8 = vadd.f32 %v183_v56, %v182_v10  ;;  %v359_v55 = vadd.f32 %v358_v34, %v357_v48  ;;  %v364_v56 = vsel %vm89_vm1, %v264_v50, 0.0  ;;  %v1054_v10 = vld [vmem:[%s1203_s0 + $0x1d0] sm:$0xff]  ;;  %v272_v34 = vmul.f32 %v924_v45, %v924_v45 }
  0x60   :  { %v205_v7 = vsel %vm89_vm1, %v1054_v10, 0.0  ;;  %v273_v50 = vmul.f32 %v934_v52, %v934_v52  ;;  %v274_v45 = vmul.f32 %v944_v59, %v944_v59  ;;  %v277_v59 = vmul.f32 %v974_v16, %v974_v16 }
  0x61   :  { %v186_v11 = vadd.f32 %v185_v63, %v184_v8  ;;  %v361_v61 = vadd.f32 %v360_v42, %v359_v55  ;;  %v366_v63 = vsel %vm89_vm1, %v265_v53, 0.0  ;;  %v1064_v8 = vld [vmem:[%s1203_s0 + $0x1d8] sm:$0xff]  ;;  %v378_v42 = vsel %vm89_vm1, %v271_v27, 0.0 }
  0x62   :  { %v207_v15 = vsel %vm89_vm1, %v1064_v8, 0.0  ;;  %v380_v53 = vsel %vm89_vm1, %v272_v34, 0.0  ;;  %v280_v16 = vmul.f32 %v1004_v39, %v1004_v39  ;;  %v283_v39 = vmul.f32 %v1034_v60, %v1034_v60 }
  0x63   :  { %v188_v14 = vadd.f32 %v187_v6, %v186_v11  ;;  %v363_v2 = vadd.f32 %v362_v49, %v361_v61  ;;  %v368_v6 = vsel %vm89_vm1, %v266_v57, 0.0  ;;  %v1074_v11 = vld [vmem:[%s1203_s0 + $0x1e0] sm:$0xff]  ;;  %v275_v61 = vmul.f32 %v954_v0, %v954_v0 }
  0x64   :  { %v209_v22 = vsel %vm89_vm1, %v1074_v11, 0.0  ;;  %v278_v0 = vmul.f32 %v984_v24, %v984_v24  ;;  %v281_v24 = vmul.f32 %v1014_v46, %v1014_v46  ;;  %v284_v46 = vmul.f32 %v1044_v5, %v1044_v5 }
  0x65   :  { %v190_v17 = vadd.f32 %v189_v13, %v188_v14  ;;  %v365_v4 = vadd.f32 %v364_v56, %v363_v2  ;;  %v370_v13 = vsel %vm89_vm1, %v267_v62, 0.0  ;;  %v1084_v14 = vld [vmem:[%s1203_s0 + $0x1e8] sm:$0xff]  ;;  %v276_v56 = vmul.f32 %v964_v9, %v964_v9 }
  0x66   :  { %v211_v30 = vsel %vm89_vm1, %v1084_v14, 0.0  ;;  %v386_v62 = vsel %vm89_vm1, %v275_v61, 0.0  ;;  %v279_v9 = vmul.f32 %v994_v31, %v994_v31  ;;  %v404_v60 = vsel %vm89_vm1, %v284_v46, 0.0 }
  0x67   :  { %v192_v20 = vadd.f32 %v191_v21, %v190_v17  ;;  %v367_v18 = vadd.f32 %v366_v63, %v365_v4  ;;  %v372_v21 = vsel %vm89_vm1, %v268_v1, 0.0  ;;  %v1094_v17 = vld [vmem:[%s1203_s0 + $0x1f0] sm:$0xff]  ;;  %v388_v4 = vsel %vm89_vm1, %v276_v56, 0.0  ;;  %v226_v56 = vld [vmem:[#allocation2 + $0x1] sm:$0x1] }
  0x68   :  { %v213_v37 = vsel %vm89_vm1, %v1094_v17, 0.0 }
  0x69   :  { %v194_v23 = vadd.f32 %v193_v28, %v192_v20  ;;  %v369_v25 = vadd.f32 %v368_v6, %v367_v18  ;;  %v374_v28 = vsel %vm89_vm1, %v269_v12, 0.0  ;;  %v1104_v20 = vld [vmem:[%s1203_s0 + $0x1f8] sm:$0xff]  ;;  %v390_v6 = vsel %vm89_vm1, %v277_v59, 0.0  ;;  %v88_v12 = vld [vmem:[#allocation2] sm:$0x1] }
  0x6b   :  { %v196_v26 = vadd.f32 %v195_v36, %v194_v23  ;;  %v371_v33 = vadd.f32 %v370_v13, %v369_v25  ;;  %v376_v36 = vsel %vm89_vm1, %v270_v19, 0.0  ;;  %v394_v25 = vsel %vm89_vm1, %v279_v9, 0.0 }
  0x6c   :  { %v282_v19 = vmul.f32 %v1024_v54, %v1024_v54  ;;  %v285_v54 = vmul.f32 %v1054_v10, %v1054_v10 }
  0x6d   :  { %v198_v29 = vadd.f32 %v197_v43, %v196_v26  ;;  %v373_v40 = vadd.f32 %v372_v21, %v371_v33  ;;  %v215_v43 = vsel %vm89_vm1, %v1104_v20, 0.0  ;;  %v396_v21 = vsel %vm89_vm1, %v280_v16, 0.0 }
  0x6e   :  { %v398_v33 = vsel %vm89_vm1, %v281_v24, 0.0  ;;  %v400_v27 = vsel %vm89_vm1, %v282_v19, 0.0  ;;  %v406_v5 = vsel %vm89_vm1, %v285_v54, 0.0 }
  0x6f   :  { %v200_v32 = vadd.f32 %v199_v51, %v198_v29  ;;  %v375_v48 = vadd.f32 %v374_v28, %v373_v40  ;;  %v382_v29 = vsel %vm89_vm1, %v273_v50, 0.0  ;;  %v289_v50 = vmul.f32 %v1094_v17, %v1094_v17 }
  0x71   :  { %v202_v35 = vadd.f32 %v201_v58, %v200_v32  ;;  %v377_v55 = vadd.f32 %v376_v36, %v375_v48  ;;  %v384_v58 = vsel %vm89_vm1, %v274_v45, 0.0  ;;  %v287_v36 = vmul.f32 %v1074_v11, %v1074_v11 }
  0x72   :  { %v288_v48 = vmul.f32 %v1084_v14, %v1084_v14 }
  0x73   :  { %v204_v38 = vadd.f32 %v203_v3, %v202_v35  ;;  %v379_v49 = vadd.f32 %v378_v42, %v377_v55 }
  0x74   :  { %v412_v11 = vsel %vm89_vm1, %v288_v48, 0.0 }
  0x75   :  { %v206_v41 = vadd.f32 %v205_v7, %v204_v38  ;;  %v381_v52 = vadd.f32 %v380_v53, %v379_v49  ;;  %v392_v38 = vsel %vm89_vm1, %v278_v0, 0.0  ;;  %v438_v0 = vld [vmem:[%s1204_s1] sm:$0x1] }
  0x77   :  { %v208_v44 = vadd.f32 %v207_v15, %v206_v41  ;;  %v383_v2 = vadd.f32 %v382_v29, %v381_v52 }
  0x79   :  { %v210_v47 = vadd.f32 %v209_v22, %v208_v44  ;;  %v385_v63 = vadd.f32 %v384_v58, %v383_v2 }
  0x7b   :  { %v212_v23 = vadd.f32 %v211_v30, %v210_v47  ;;  %v387_v35 = vadd.f32 %v386_v62, %v385_v63  ;;  %v402_v30 = vsel %vm89_vm1, %v283_v39, 0.0  ;;  %v286_v47 = vmul.f32 %v1064_v8, %v1064_v8 }
  0x7c   :  { %v410_v8 = vsel %vm89_vm1, %v287_v36, 0.0 }
  0x7d   :  { %v214_v26 = vadd.f32 %v213_v37, %v212_v23  ;;  %v389_v7 = vadd.f32 %v388_v4, %v387_v35  ;;  %v408_v10 = vsel %vm89_vm1, %v286_v47, 0.0 }
  0x7f   :  { %v216_v51 = vadd.f32 %v215_v43, %v214_v26  ;;  %v391_v13 = vadd.f32 %v390_v6, %v389_v7  ;;  %v290_v43 = vmul.f32 %v1104_v20, %v1104_v20  ;;  %v414_v26 = vsel %vm89_vm1, %v289_v50, 0.0 }
  0x81   :  { %v217_v57 = vrot.slane %v216_v51, 4  ;;  %v393_v41 = vadd.f32 %v392_v38, %v391_v13  ;;  %v416_v14 = vsel %vm89_vm1, %v290_v43, 0.0 }
  0x83   :  { %v218_v32 = vadd.f32 %v217_v57, %v216_v51  ;;  %v395_v22 = vadd.f32 %v394_v25, %v393_v41 }
  0x85   :  { %v219_v3 = vrot.slane %v218_v32, 2  ;;  %v397_v44 = vadd.f32 %v396_v21, %v395_v22 }
  0x87   :  { %v220_v1 = vadd.f32 %v219_v3, %v218_v32  ;;  %v399_v28 = vadd.f32 %v398_v33, %v397_v44 }
  0x89   :  { %v221_v18 = vrot.slane %v220_v1, 1  ;;  %v401_v40 = vadd.f32 %v400_v27, %v399_v28 }
  0x8b   :  { %v222_v15 = vadd.f32 %v221_v18, %v220_v1  ;;  %v403_v34 = vadd.f32 %v402_v30, %v401_v40  ;;  %v441_v1 = vld [vmem:[%s1205_s2] sm:$0x1] }
  0x8d   :  { %v223_v31 = vadd.f32 %v222_v15, %v88_v12  ;;  %v405_v37 = vadd.f32 %v404_v60, %v403_v34 }
  0x8f   :  { %225 = vst.msk [vmem:[#allocation2] sm:$0x1] %vm224_vm2, %v223_v31  ;;  %v407_v23 = vadd.f32 %v406_v5, %v405_v37 }
  0x91   :  { %v409_v42 = vadd.f32 %v408_v10, %v407_v23 }
  0x93   :  { %v411_v55 = vadd.f32 %v410_v8, %v409_v42 }
  0x95   :  { %v413_v45 = vadd.f32 %v412_v11, %v411_v55 }
  0x96   :  { %v429_v2 = vld [vmem:[#allocation2] sm:$0x1] }
  0x97   :  { %v415_v53 = vadd.f32 %v414_v26, %v413_v45  ;;  %v431_v20 = vmul.f32 0.001953125, %v429_v2 }
  0x99   :  { %v417_v49 = vadd.f32 %v416_v14, %v415_v53  ;;  %v434_v32 = vmul.f32 %v431_v20, %v431_v20 }
  0x9b   :  { %v418_v51 = vrot.slane %v417_v49, 4 }
  0x9d   :  { %v419_v61 = vadd.f32 %v418_v51, %v417_v49 }
  0x9f   :  { %v420_v29 = vrot.slane %v419_v61, 2 }
  0xa1   :  { %v421_v17 = vadd.f32 %v420_v29, %v419_v61 }
  0xa3   :  { %v422_v52 = vrot.slane %v421_v17, 1 }
  0xa5   :  { %v423_v57 = vadd.f32 %v422_v52, %v421_v17 }
  0xa7   :  { %v424_v58 = vadd.f32 %v423_v57, %v226_v56 }
  0xa9   :  { %425 = vst.msk [vmem:[#allocation2 + $0x1] sm:$0x1] %vm224_vm2, %v424_v58 }
  0xb0   :  { %v432_v59 = vld [vmem:[#allocation2 + $0x1] sm:$0x1] }
  0xb1   :  { %v433_v62 = vmul.f32 0.001953125, %v432_v59 }
  0xb3   :  { %v435_v63 = vsub.f32 %v433_v62, %v434_v32 }
  0xb5   :  { %v436_v3 = vadd.f32 1e-05, %v435_v63 }
  0xb7   :  { %476 = vrsqrt.f32 %v436_v3 }
  0xc1   :  { %v477_v4 = vpop.eup %476 }
  0xc2   :  { %v439_v35 = vmul.f32 %v477_v4, %v438_v0 }
  0xc4   :  { %440 = vst.msk [vmem:[#allocation3] sm:$0x1] %vm224_vm2, %v439_v35  ;;  %v442_v9 = vmul.f32 %v439_v35, %v431_v20 }
  0xc5   :  { %489 = shalt.err (!%p486_p4)
}
  0xc6   :  { %s490_s23 = scalar_lea.hbm %s1206_s3, 16 }
  0xc7   :  { %p491_p5 = scmp.ne.s32.totalorder %s1206_s3, %s490_s23  ;;  %p494_p6 = scmp.lt.u32.totalorder %s490_s23, %s1206_s3 }
  0xc9   :  { %p496_p7 = pnand %p494_p6, %p491_p5 }
  0xcb   :  { %499 = shalt.err (!%p496_p7)
}
  0xcc   :  { %454 = dma.vmem_to_hbm [thread:$0]  %s452_s15, 16, %s1206_s3, [#allocation4]   ;;  %v443_v6 = vsub.f32 %v441_v1, %v442_v9 }
  0xcd   :  { %s500_s29 = scalar_lea.vmem %s462_s19, 16  ;;  %s504_s30 = scalar_lea.vmem %s462_s19, 32 }
  0xce   :  { %444 = vst.msk [vmem:[#allocation5] sm:$0x1] %vm224_vm2, %v443_v6  ;;  %p501_p8 = scmp.ne.s32.totalorder %s462_s19, %s500_s29  ;;  %p505_p9 = scmp.lt.s32.totalorder %s462_s19, %s462_s19 }
  0xcf   :  { %p506_p10 = scmp.lt.s32.totalorder %s504_s30, %s500_s29 }
  0xd1   :  { %p507_p11 = por %p506_p10, %p505_p9 }
  0xd3   :  { %p508_p12 = pnand %p507_p11, %p501_p8 }
  0xd5   :  { %511 = shalt.err (!%p508_p12)
}
  0xd6   :  { %s512_s7 = scalar_lea.hbm %s1207_s4, 16 }
  0xd7   :  { %p513_p13 = scmp.ne.s32.totalorder %s1207_s4, %s512_s7  ;;  %p516_p0 = scmp.lt.u32.totalorder %s512_s7, %s1207_s4 }
  0xd9   :  { %p518_p1 = pnand %p516_p0, %p513_p13 }
  0xdb   :  { %521 = shalt.err (!%p518_p1)
}
  0xdc   :  { %464 = dma.vmem_to_hbm [thread:$0]  %s462_s19, 16, %s1207_s4, [#allocation6]  }
  0xdd   :  { %522 = dma.done.wait [#allocation4], 16  }
  0xde   :  { %523 = vsyncadd [#allocation4], 4294967280 }
  0xdf   :  { %524 = dma.done.wait [#allocation6], 16  }
  0xe0   :  { %525 = vsyncadd [#allocation6], 4294967280 }
  0xe1   :  { %471 = vsyncpa [#allocation4], 1 }
  0xe2   :  { %472 = vsyncpa [#allocation6], 1 }

</bundles_post_ra>
